<compile_context>
chip_gen: v7x
topology: tpu7x:2x2x1
jax: 0.10.0
libtpu: 0.0.40
codegen_flags: <defaults>
</compile_context>

<pallas_src>
import jax
import jax.numpy as jnp
from jax import lax
from jax.experimental import pallas as pl
from jax.experimental.pallas import tpu as pltpu


_DN_LAST_LAST = (((1,), (1,)), ((), ()))   # (m,k) . (n,k) -> (m,n)  (x @ W^T)
_DN_LAST_FIRST = (((1,), (0,)), ((), ()))  # (m,k) . (k,n) -> (m,n)


def llama_mlp_kernel(x_ref, wgu_ref, wdt_ref, o_ref, acc_ref):
    # Grid: (M // tm, I // ti); axis 1 (intermediate dim) is the reduction axis.
    # x_ref   : (tm, H)     activation tile, resident across the reduction
    # wgu_ref : (2, ti, H)  stacked [gate; up] weight slice (one DMA stream)
    # wdt_ref : (ti, H)     down_proj weight slice, pre-transposed (contiguous rows)
    # o_ref   : (tm, H)     output tile (same block index for every j)
    # acc_ref : (tm, H)     float32 accumulator scratch
    j = pl.program_id(1)

    @pl.when(j == 0)
    def _():
        acc_ref[...] = jnp.zeros_like(acc_ref)

    x = x_ref[...]
    # gate/up: contract H (last dim of both operands) — MXU-friendly x @ W^T,
    # no per-tile transpose of the weight slice.
    gate = lax.dot_general(x, wgu_ref[0], _DN_LAST_LAST,
                           preferred_element_type=jnp.float32)
    up = lax.dot_general(x, wgu_ref[1], _DN_LAST_LAST,
                         preferred_element_type=jnp.float32)
    # SiLU(gate) * up in f32 (EUP sigmoid + VPU muls hide under MXU work),
    # then cast to bf16 for the down projection (matches standard practice).
    h = (gate * jax.nn.sigmoid(gate) * up).astype(x.dtype)
    # Partial down projection for this slice of I, accumulated in f32.
    # (On v7x the MRB can keep this accumulation in-place.)
    acc_ref[...] += lax.dot_general(h, wdt_ref[...], _DN_LAST_FIRST,
                                    preferred_element_type=jnp.float32)

    @pl.when(j == pl.num_programs(1) - 1)
    def _():
        o_ref[...] = acc_ref[...].astype(o_ref.dtype)


def _chip_defaults():
    """Per-generation (tm, ti, VMEM budget) defaults from the roofline."""
    kind = ""
    try:
        kind = jax.devices()[0].device_kind.lower()
    except Exception:
        pass
    if "v6" in kind:
        return 768, 512, 100 << 20   # 128 MiB physical; needs big tm to be compute-bound
    if "v7" in kind:
        return 512, 512, 52 << 20    # 64 MiB physical per TC: leave headroom
    if "v5" in kind:
        return 256, 1024, 96 << 20   # knee ~240 rows; big ti cuts accumulator RMW
    return 512, 512, 48 << 20        # conservative fallback


def _pick_ti(intermediate, max_ti):
    """Largest multiple of 128 that divides `intermediate` and is <= max_ti."""
    if intermediate <= 128:
        return intermediate
    t = min(max_ti, intermediate)
    t = (t // 128) * 128
    while t >= 128:
        if intermediate % t == 0:
            return t
        t -= 128
    return intermediate  # no 128-multiple divisor; keep whole dim resident


def prepare_llama_mlp_weights(w_gate, w_up, w_down, compute_dtype=jnp.bfloat16):
    """One-time weight prep (do NOT call per forward):
       - cast to the compute dtype (bf16) once,
       - stack gate/up into (2, I, H) so each reduction step is one DMA stream,
       - transpose down_proj to (I, H) so slices are contiguous rows."""
    I, H = w_gate.shape
    assert w_up.shape == (I, H) and w_down.shape == (H, I)
    w_gate_up = jnp.stack([jnp.asarray(w_gate), jnp.asarray(w_up)]).astype(compute_dtype)
    w_down_t = jnp.asarray(w_down).T.astype(compute_dtype)  # (I, H)
    return w_gate_up, w_down_t


def llama_mlp(x, w_gate_up, w_down_t, *, tm=None, ti=None,
              compute_dtype=jnp.bfloat16, vmem_limit_bytes=None):
    """LlamaMLP forward.

    x:         (batch, seq, hidden)
    w_gate_up: (2, intermediate, hidden)   from prepare_llama_mlp_weights
    w_down_t:  (intermediate, hidden)      pre-transposed down_proj weight
    """
    B, S, H = x.shape
    two, I, H2 = w_gate_up.shape
    assert two == 2 and H2 == H and w_down_t.shape == (I, H)

    M = B * S
    out_dtype = x.dtype
    wb = jnp.dtype(compute_dtype).itemsize

    tm_def, ti_def, vmem_cap = _chip_defaults()
    tm = tm_def if tm is None else tm
    ti = ti_def if ti is None else ti

    # ---- tile sizing -------------------------------------------------------
    tm = min(tm, M)
    if tm >= 128:
        tm = (tm // 128) * 128           # MXU-sized row tiles
    else:
        tm = ((tm + 15) // 16) * 16      # bf16 sublane packing for tiny decode M
    m_pad = pl.cdiv(M, tm) * tm

    ti = _pick_ti(I, ti)

    def footprint(tm_, ti_):
        # Double-buffered pipelined tiles + resident f32 accumulator.
        return (2 * wb * tm_ * H           # x tile
                + 2 * wb * 2 * ti_ * H     # stacked gate+up slice
                + 2 * wb * ti_ * H         # down slice
                + 2 * wb * tm_ * H         # output tile
                + 4 * tm_ * H)             # f32 accumulator scratch

    # Shrink tiles if the footprint would exceed the per-generation budget.
    while footprint(tm, ti) > vmem_cap and tm > 128:
        tm = max(128, tm - 128)
        m_pad = pl.cdiv(M, tm) * tm
    while footprint(tm, ti) > vmem_cap and ti > 128:
        smaller = _pick_ti(I, ti - 1)
        if smaller >= ti:
            break
        ti = smaller

    if vmem_limit_bytes is None:
        vmem_limit_bytes = int(min(vmem_cap,
                                   max(int(1.25 * footprint(tm, ti)), 32 << 20)))

    # ---- activations (weights were prepared once, outside the hot path) ----
    x2d = x.reshape(M, H).astype(compute_dtype)
    if m_pad != M:
        # TODO(synk): handle the ragged last row-tile in-kernel with a mask to
        # avoid materializing a padded copy of the activations for large M.
        x2d = jnp.pad(x2d, ((0, m_pad - M), (0, 0)))

    grid = (m_pad // tm, I // ti)

    cost = pl.CostEstimate(
        flops=6 * m_pad * H * I,                       # 3 matmuls x 2 flops
        transcendentals=m_pad * I,                     # sigmoid
        bytes_accessed=3 * I * H * wb + 2 * m_pad * H * wb,
    )

    out2d = pl.pallas_call(
        llama_mlp_kernel,
        out_shape=jax.ShapeDtypeStruct((m_pad, H), out_dtype),
        grid_spec=pltpu.PrefetchScalarGridSpec(
            num_scalar_prefetch=0,
            grid=grid,
            in_specs=[
                # x depends only on i -> stays resident across the reduction.
                pl.BlockSpec((tm, H), lambda i, j: (i, 0)),
                # One DMA stream for the stacked gate+up slice.
                pl.BlockSpec((2, ti, H), lambda i, j: (0, j, 0)),
                # Contiguous-row slice of the pre-transposed down weight.
                pl.BlockSpec((ti, H), lambda i, j: (j, 0)),
            ],
            out_specs=pl.BlockSpec((tm, H), lambda i, j: (i, 0)),
            scratch_shapes=[pltpu.VMEM((tm, H), jnp.float32)],
        ),
        compiler_params=pltpu.CompilerParams(
            dimension_semantics=("parallel", "arbitrary"),
            vmem_limit_bytes=vmem_limit_bytes,
        ),
        cost_estimate=cost,
    )(x2d, w_gate_up, w_down_t)

    # TODO(synk): on v7x decode (grid i-axis == 1) split the I reduction across
    # the 2 TensorCores (two partial accumulators + reduction) to use both MXUs.
    return out2d[:M].reshape(B, S, H)


if __name__ == "__main__":
    # Small but tile-aligned shapes consistent with the module's forward.
    batch, seq, hidden, intermediate = 2, 64, 256, 512

    key = jax.random.PRNGKey(0)
    kx, kg, ku, kd = jax.random.split(key, 4)

    x = jax.random.normal(kx, (batch, seq, hidden), dtype=jnp.float32)
    lim_h = 1.0 / hidden ** 0.5
    lim_i = 1.0 / intermediate ** 0.5
    w_gate = jax.random.uniform(kg, (intermediate, hidden), jnp.float32,
                                minval=-lim_h, maxval=lim_h)
    w_up = jax.random.uniform(ku, (intermediate, hidden), jnp.float32,
                              minval=-lim_h, maxval=lim_h)
    w_down = jax.random.uniform(kd, (hidden, intermediate), jnp.float32,
                                minval=-lim_i, maxval=lim_i)

    # One-time weight prep (cast + stack + transpose).
    w_gate_up, w_down_t = prepare_llama_mlp_weights(w_gate, w_up, w_down)

    # ti=256 forces 2 reduction steps over I so the accumulator path is exercised.
    out = llama_mlp(x, w_gate_up, w_down_t, tm=128, ti=256)
    jax.block_until_ready(out)

    # Reference mirroring the kernel's precision (bf16 matmul operands,
    # f32 accumulation): down(silu(gate(x)) * up(x)).
    dn = (((1,), (1,)), ((), ()))
    xb = x.reshape(-1, hidden).astype(jnp.bfloat16)
    gate = lax.dot_general(xb, w_gate.astype(jnp.bfloat16), dn,
                           preferred_element_type=jnp.float32)
    up = lax.dot_general(xb, w_up.astype(jnp.bfloat16), dn,
                         preferred_element_type=jnp.float32)
    h = (gate * jax.nn.sigmoid(gate) * up).astype(jnp.bfloat16)
    ref = lax.dot_general(h, w_down.astype(jnp.bfloat16), dn,
                          preferred_element_type=jnp.float32)
    ref = ref.reshape(batch, seq, hidden).astype(x.dtype)

    assert jnp.allclose(out, ref, atol=1e-2, rtol=1e-2), "mismatch vs reference"
    print("KERNEL_OK")
</pallas_src>

<mosaic_0001>
module attributes {stable_mosaic.version = 11 : i64} {
  func.func @llama_mlp_kernel(%arg0: i32, %arg1: i32, %arg2: memref<128x256xbf16, #tpu.memory_space<vmem>>, %arg3: memref<2x256x256xbf16, #tpu.memory_space<vmem>>, %arg4: memref<256x256xbf16, #tpu.memory_space<vmem>>, %arg5: memref<128x256xf32, #tpu.memory_space<vmem>>, %arg6: memref<128x256xf32, #tpu.memory_space<vmem>>) attributes {dimension_semantics = [#tpu.dimension_semantics<parallel>, #tpu.dimension_semantics<arbitrary>], iteration_bounds = array<i64: 1, 2>, scalar_prefetch = 0 : i64, scratch_operands = 1 : i64, tpu.core_type = #tpu.core_type<tc>, window_params = [{transform_indices = @transform_0, window_bounds = array<i64: 128, 256>}, {transform_indices = @transform_1, window_bounds = array<i64: 2, 256, 256>}, {transform_indices = @transform_2, window_bounds = array<i64: 256, 256>}, {transform_indices = @transform_3, window_bounds = array<i64: 128, 256>}]} {
    %c0_i32 = arith.constant 0 : i32
    %0 = arith.cmpi eq, %arg1, %c0_i32 : i32
    %1 = arith.extui %0 : i1 to i32
    %c0_i32_0 = arith.constant 0 : i32
    %2 = arith.cmpi ne, %1, %c0_i32_0 : i32
    scf.if %2 {
      %cst_17 = arith.constant 0.000000e+00 : f32
      %26 = vector.broadcast %cst_17 : f32 to vector<128x256xf32>
      %c0_18 = arith.constant 0 : index
      %c0_19 = arith.constant 0 : index
      %27 = vector.load %arg6[%c0_18, %c0_19] : memref<128x256xf32, #tpu.memory_space<vmem>>, vector<128x256xf32>
      tpu.vector_store %arg6[%c0_18, %c0_19], %26 {strides = array<i32>} : memref<128x256xf32, #tpu.memory_space<vmem>>, vector<128x256xf32>,
    } else {
    }
    %c0 = arith.constant 0 : index
    %c0_1 = arith.constant 0 : index
    %3 = vector.load %arg2[%c0, %c0_1] : memref<128x256xbf16, #tpu.memory_space<vmem>>, vector<128x256xbf16>
    %c0_2 = arith.constant 0 : index
    %c0_3 = arith.constant 0 : index
    %c0_4 = arith.constant 0 : index
    %4 = vector.load %arg3[%c0_2, %c0_3, %c0_4] : memref<2x256x256xbf16, #tpu.memory_space<vmem>>, vector<1x256x256xbf16>
    %5 = vector.shape_cast %4 : vector<1x256x256xbf16> to vector<256x256xbf16>
    %cst = arith.constant dense<0.000000e+00> : vector<128x256xf32>
    %6 = tpu.matmul %3, %5, %cst {dimension_numbers = #tpu.dot_dimension_numbers<[1], [1], [0], [0], [0, 0, 1, 0], [], []>} : vector<128x256xbf16>, vector<256x256xbf16>, vector<128x256xf32> -> vector<128x256xf32>
    %c1 = arith.constant 1 : index
    %c0_5 = arith.constant 0 : index
    %c0_6 = arith.constant 0 : index
    %7 = vector.load %arg3[%c1, %c0_5, %c0_6] : memref<2x256x256xbf16, #tpu.memory_space<vmem>>, vector<1x256x256xbf16>
    %8 = vector.shape_cast %7 : vector<1x256x256xbf16> to vector<256x256xbf16>
    %cst_7 = arith.constant dense<0.000000e+00> : vector<128x256xf32>
    %9 = tpu.matmul %3, %8, %cst_7 {dimension_numbers = #tpu.dot_dimension_numbers<[1], [1], [0], [0], [0, 0, 1, 0], [], []>} : vector<128x256xbf16>, vector<256x256xbf16>, vector<128x256xf32> -> vector<128x256xf32>
    %10 = arith.negf %6 : vector<128x256xf32>
    %11 = math.exp %10 : vector<128x256xf32>
    %cst_8 = arith.constant 1.000000e+00 : f32
    %12 = vector.broadcast %cst_8 : f32 to vector<128x256xf32>
    %13 = arith.addf %12, %11 : vector<128x256xf32>
    %14 = arith.divf %12, %13 : vector<128x256xf32>
    %15 = arith.mulf %6, %14 : vector<128x256xf32>
    %16 = arith.mulf %15, %9 : vector<128x256xf32>
    %17 = arith.truncf %16 : vector<128x256xf32> to vector<128x256xbf16>
    %c0_9 = arith.constant 0 : index
    %c0_10 = arith.constant 0 : index
    %18 = vector.load %arg6[%c0_9, %c0_10] : memref<128x256xf32, #tpu.memory_space<vmem>>, vector<128x256xf32>
    %c0_11 = arith.constant 0 : index
    %c0_12 = arith.constant 0 : index
    %19 = vector.load %arg4[%c0_11, %c0_12] : memref<256x256xbf16, #tpu.memory_space<vmem>>, vector<256x256xbf16>
    %cst_13 = arith.constant dense<0.000000e+00> : vector<128x256xf32>
    %20 = tpu.matmul %17, %19, %cst_13 {dimension_numbers = #tpu.dot_dimension_numbers<[1], [0], [0], [1], [0, 0, 1, 1], [], []>} : vector<128x256xbf16>, vector<256x256xbf16>, vector<128x256xf32> -> vector<128x256xf32>
    %21 = arith.addf %18, %20 : vector<128x256xf32>
    %c0_14 = arith.constant 0 : index
    %c0_15 = arith.constant 0 : index
    %22 = vector.load %arg6[%c0_14, %c0_15] : memref<128x256xf32, #tpu.memory_space<vmem>>, vector<128x256xf32>
    tpu.vector_store %arg6[%c0_14, %c0_15], %21 {strides = array<i32>} : memref<128x256xf32, #tpu.memory_space<vmem>>, vector<128x256xf32>,
    %c1_i32 = arith.constant 1 : i32
    %23 = arith.cmpi eq, %arg1, %c1_i32 : i32
    %24 = arith.extui %23 : i1 to i32
    %c0_i32_16 = arith.constant 0 : i32
    %25 = arith.cmpi ne, %24, %c0_i32_16 : i32
    scf.if %25 {
      %c0_17 = arith.constant 0 : index
      %c0_18 = arith.constant 0 : index
      %26 = vector.load %arg6[%c0_17, %c0_18] : memref<128x256xf32, #tpu.memory_space<vmem>>, vector<128x256xf32>
      %c0_19 = arith.constant 0 : index
      %c0_20 = arith.constant 0 : index
      %27 = vector.load %arg5[%c0_19, %c0_20] : memref<128x256xf32, #tpu.memory_space<vmem>>, vector<128x256xf32>
      tpu.vector_store %arg5[%c0_19, %c0_20], %26 {strides = array<i32>} : memref<128x256xf32, #tpu.memory_space<vmem>>, vector<128x256xf32>,
    } else {
    }
    return
  }
  func.func @transform_0(%arg0: i32, %arg1: i32) -> (i32, i32) {
    %c0_i32 = arith.constant 0 : i32
    %c0_i32_0 = arith.constant 0 : i32
    return %arg0, %c0_i32 : i32, i32
  }
  func.func @transform_1(%arg0: i32, %arg1: i32) -> (i32, i32, i32) {
    %c0_i32 = arith.constant 0 : i32
    %c0_i32_0 = arith.constant 0 : i32
    %c0_i32_1 = arith.constant 0 : i32
    return %c0_i32, %arg1, %c0_i32_0 : i32, i32, i32
  }
  func.func @transform_2(%arg0: i32, %arg1: i32) -> (i32, i32) {
    %c0_i32 = arith.constant 0 : i32
    %c0_i32_0 = arith.constant 0 : i32
    return %arg1, %c0_i32 : i32, i32
  }
  func.func @transform_3(%arg0: i32, %arg1: i32) -> (i32, i32) {
    %c0_i32 = arith.constant 0 : i32
    %c0_i32_0 = arith.constant 0 : i32
    return %arg0, %c0_i32 : i32, i32
  }
}

</mosaic_0001>

<bundles_post_ra>
// kernel: tpu_custom_call.1
= control target key start
LH: loop header
LB: loop body
LE: loop exit
PB: predicated region body
PF: predicated region fallthrough
CT: control target
= control target key end

     0   :  { %8 = vsyncpa [#allocation4], 0  ;;  %s3197_s0 = inlined_call_operand.hbm [shape: bf16[128,256], index: 0, kind: input, shape index: {}]   ;;  %s3198_s1 = inlined_call_operand.hbm [shape: bf16[2,512,256], index: 1, kind: input, shape index: {}]   ;;  %s3199_s2 = inlined_call_operand.hbm [shape: bf16[512,256], index: 2, kind: input, shape index: {}]   ;;  %s3200_s3 = inlined_call_operand.hbm [shape: f32[128,256], index: 3, kind: output, shape index: {}]  }
   0x1   :  { %9 = vsyncpa [#allocation7], 0 }
   0x2   :  { %11 = vsyncpa [#allocation7 + $0x1], 0 }
   0x3   :  { %12 = vsyncpa [#allocation5], 0  ;;  %s2678_s12 = smov 0   ;;  %s2680_s13 = smov 0  }
   0x4   :  { %s2682_s14 = smov 0   ;;  %s2684_s15 = smov 0  }
   0x5   :  { %s2686_s16 = smov 0   ;;  %s2688_s17 = smov 0  }
   0x6 LB: > { %s2707_s18 = sadd.s32 4294967295, %s2640_s17   ;;  %s27_s19 = sadd.s32 1, %s2636_s16  ;;  %s2640_s17 = sphi %s2688_s17, %s18_s17   ;;  %s2636_s16 = sphi %s2686_s16, %s3218_s16   ;;  %s2632_s15 = sphi %s2684_s15, %s3217_s15   ;;  %s2628_s14 = sphi %s2682_s14, %s3216_s14   ;;  %s2624_s13 = sphi %s2680_s13, %s3215_s13   ;;  %s2620_s12 = sphi %s2678_s12, %s3214_s12  }
   0x7   : > { %p28_p0 = scmp.ge.s32.totalorder %s27_s19, 2  ;;  %s63_s20 = sadd.s32 1, %s2628_s14 }
   0x8   : > { %p70_p1 = scmp.ne.s32.totalorder %s2628_s14, %s2624_s13  ;;  %p71_p2 = scmp.eq.s32.totalorder %s2640_s17, 0 }
   0x9   : > { %s3220_s19 = smov (%p28_p0, %s27_s19), 0  ;;  %p76_p4 = scmp.ne.s32.totalorder %s2624_s13, %s2620_s12 }
   0xa   : > { %p2716_p3 = por %p71_p2, %p70_p1  ;;  %s60_s22 = ssub.s32 %s2636_s16, %s3220_s19 }
   0xb   : > { %p3201_p5 = scmp.eq.s32.totalorder %s2707_s18, 0  ;;  %p61_p6 = scmp.eq.s32.totalorder %s60_s22, 0 }
   0xc   : > { %s3205_s21 = scalar_select %p2716_p3, 1, 0 }
   0xd   : > { %p1879_p7 = scmp.ge.s32.totalorder %s2640_s17, 1  ;;  %p2727_p8 = por %p3201_p5, %p76_p4 }
   0xe   : > { %p139_p9 = scmp.lt.s32.totalorder %s2640_s17, 3  ;;  %s2642_s26 = smov [#allocation3]  }
   0xf   : > { %s3206_s23 = scalar_select %p2727_p8, 1, 0 }
  0x10   : > { %s2733_s24 = scalar_select %p61_p6, %s2628_s14, %s63_s20  }
  0x11   : > { %p2735_p10 = pnand %p1879_p7, %p139_p9  ;;  %s155_s27 = sshll.u32 %s2642_s26, 4  ;;  %s156_s27 = int_to_ptr.vmem [resolvable:$true] %s155_s27 }
  0x12   : > { %s2500_s4 = scalar_lea.hbm %s3197_s0, 2048 }
  0x13   : > { %s3207_s25 = scalar_select %p2735_p10, 1, 0 }
  0x14   : > { %p2133_p11 = pneg %p2735_p10  ;;  %p2501_p13 = scmp.ne.s32.totalorder %s3197_s0, %s2500_s4 }
  0x15   : > { %p2507_p4 = scmp.lt.u32.totalorder %s2500_s4, %s3197_s0 }
  0x16   : > { %p2743_p12 = pnand %p2133_p11, %p3201_p5 }
  0x18   : > { %p2502_p0 = pneg %p2743_p12 }
  0x1a   : > { %p2503_p1 = pnand %p2502_p0, %p2501_p13 }
  0x1c   : > { %p2504_p2 = pneg %p2503_p1 }
  0x1e   : > { %p2509_p6 = pnand %p2507_p4, %p2504_p2 }
  0x20   : > { %2512 = shalt.err (!%p2509_p6)
}
  0x21   : > { %s2513_s9 = scalar_lea.vmem %s156_s27, 2048  ;;  %p2521_p5 = scmp.lt.s32.totalorder %s156_s27, %s156_s27 }
  0x22   : > { %p2514_p7 = scmp.ne.s32.totalorder %s156_s27, %s2513_s9  ;;  %p2522_p8 = scmp.lt.s32.totalorder %s2513_s9, %s2513_s9 }
  0x24   : > { %p2516_p9 = pnand %p2514_p7, %p2502_p0  ;;  %p2523_p10 = por %p2522_p8, %p2521_p5 }
  0x26   : > { %p2517_p11 = pneg %p2516_p9 }
  0x28   : > { %p2524_p3 = pnand %p2523_p10, %p2517_p11 }
  0x2a   : > { %2527 = shalt.err (!%p2524_p3)
}
  0x2b   : > { %s2643_s10 = smov 128   ;;  %s2644_s11 = smov 8  }
  0x2c   : > { %2136 = dma.hbm_to_vmem [thread:$0]  (!%p2743_p12), %s3197_s0, 2048, %s156_s27, [#allocation4], %s2643_s10, %s2643_s10, %s2644_s11  }
  0x2d   : > { %p1881_p13 = scmp.ge.s32.totalorder %s2640_s17, 2 }
  0x2f   : > { %165 = sbr.rel (%p1881_p13) target bundleno = 93 (0x5d), region = 20 }
  0x36   : > { %s169_s22 = sand.u32 1, %s2640_s17   ;;  %s171_s26 = sand.u32 1, %s2628_s14  }
  0x37   : > { %s1882_s29 = sshll.u32 %s171_s26, 9  ;;  %s2079_s28 = sshll.u32 %s2636_s16, 12 }
  0x38   : > { %s180_s27 = scalar_lea.hbm %s3198_s1, %s2079_s28  ;;  %p3209_p3 = scmp.ne.s32.totalorder %s3205_s21, 0 }
  0x39   : > { %s173_s6 = scalar_lea.vmem [#allocation6], %s1882_s29  ;;  %s2645_s9 = smov 8192  }
  0x3a   : > { %s2116_s5 = scalar_select %p3209_p3, [#allocation0], [#allocation12] }
  0x3b   : > { %s193_s7 = sshll.u32 %s173_s6, 4  ;;  %2117 = sst [smem:[#allocation11]] (%p3209_p3), %s2645_s9  ;;  %s194_s7 = int_to_ptr.vmem [resolvable:$true] %s193_s7 }
  0x3c   : > { %s185_s8 = sld [smem:[%s2116_s5]]   ;;  %s2646_s10 = smov 4096  }
  0x3d   : > { %2118 = sst [smem:[#allocation11 + $0x1]] (%p3209_p3), %s2646_s10  ;;  %s2647_s11 = smov 32  }
  0x3e   : > { %2119 = sst [smem:[#allocation11 + $0x2]] (%p3209_p3), %s2647_s11  ;;  %s2648_s12 = smov 128  }
  0x3f   : > { %2120 = sst [smem:[#allocation11 + $0x3]] (%p3209_p3), %s2648_s12  ;;  %s2649_s29 = smov 8  }
  0x40   : > { %2121 = sst [smem:[#allocation11 + $0x4]] (%p3209_p3), %s2648_s12  ;;  %s2784_s4 = scalar_lea.sflag [#allocation7], %s169_s22 }
  0x41   : > { %2122 = sst [smem:[#allocation11 + $0x5]] (%p3209_p3), %s2649_s29  ;;  %s2650_s5 = smov [#allocation10]  }
  0x42   : > { %s1886_s20 = sshll.u32 %s185_s8, 26  ;;  %s1888_s6 = sshll.u32 %s171_s26, 8 }
  0x43   : > { %s1887_s30 = sadd.s32 134217728, %s1886_s20  ;;  %s2792_s11 = scalar_lea.hbm %s3199_s2, %s2079_s28 }
  0x44   : > { %2123 = dma.general (%p3209_p3), %s180_s27, 8192, %s194_s7, %s2784_s4, %s2650_s5, [#allocation11], %s1887_s30, 0  }
  0x45   : > { %s220_s8 = scalar_lea.vmem [#allocation8], %s1888_s6  ;;  %s2528_s22 = scalar_lea.hbm %s2792_s11, 4096 }
  0x46   : > { %s228_s12 = sshll.u32 %s220_s8, 4  ;;  %p2529_p5 = scmp.ne.s32.totalorder %s2792_s11, %s2528_s22  ;;  %s2794_s12 = int_to_ptr.vmem [resolvable:$true] %s228_s12 }
  0x47   : > { %s2532_s7 = scalar_lea.hbm %s3199_s2, 8192  ;;  %p2533_p12 = scmp.lt.u32.totalorder %s2792_s11, %s3199_s2 }
  0x48   : > { %p2530_p8 = pnand %p2529_p5, %p3209_p3  ;;  %p2534_p0 = scmp.lt.u32.totalorder %s2532_s7, %s2528_s22 }
  0x49   : > { %p2536_p2 = scmp.lt.u32.totalorder %s2528_s22, %s2792_s11 }
  0x4a   : > { %p2531_p10 = pneg %p2530_p8  ;;  %p2535_p1 = por %p2534_p0, %p2533_p12 }
  0x4c   : > { %p2537_p4 = por %p2536_p2, %p2535_p1 }
  0x4e   : > { %p2538_p6 = pnand %p2537_p4, %p2531_p10 }
  0x50   : > { %2541 = shalt.err (!%p2538_p6)
}
  0x51   : > { %s2542_s29 = scalar_lea.vmem %s2794_s12, 4096  ;;  %s2651_s30 = smov [#allocation8]  }
  0x52   : > { %p2543_p7 = scmp.ne.s32.totalorder %s2794_s12, %s2542_s29  ;;  %s2546_s5 = sshll.u32 %s2651_s30, 4  ;;  %s2547_s5 = int_to_ptr.vmem [resolvable:$false] %s2546_s5 }
  0x53   : > { %s2548_s6 = scalar_lea.vmem %s2547_s5, 8192  ;;  %p2549_p13 = scmp.lt.s32.totalorder %s2794_s12, %s2547_s5 }
  0x54   : > { %p2544_p9 = pnand %p2543_p7, %p3209_p3  ;;  %p2550_p5 = scmp.lt.s32.totalorder %s2548_s6, %s2542_s29 }
  0x56   : > { %p2545_p11 = pneg %p2544_p9  ;;  %p2551_p8 = por %p2550_p5, %p2549_p13 }
  0x58   : > { %p2552_p12 = pnand %p2551_p8, %p2545_p11 }
  0x5a   : > { %2555 = shalt.err (!%p2552_p12)
}
  0x5b   : > { %s2652_s9 = smov 128   ;;  %s2653_s10 = smov 8  }
  0x5c   : > { %2124 = dma.hbm_to_vmem [thread:$0]  (%p3209_p3), %s2792_s11, 4096, %s2794_s12, %s2784_s4, %s2652_s9, %s2652_s9, %s2653_s10  }
  0x5d PF: > { %p3210_p10 = scmp.ne.s32.totalorder %s3207_s25, 0 }
  0x5e   : > { %p3211_p0 = scmp.eq.s32.totalorder (!%p3210_p10), %s2707_s18, 0 }
  0x5f   : > { %240 = sbr.rel (%p3210_p10) target bundleno = 814 (0x32e), region = 32 }
  0x66   : > { %2607 = dma.done.wait (%p3211_p0), [#allocation4], 2048   ;;  %p3212_p1 = pmov %p3211_p0 }
  0x67   : > { %s246_s8 = sand.u32 1, %s2707_s18   ;;  %s248_s22 = sand.u32 1, %s2624_s13  }
  0x68   : > { %2609 = vsyncadd (%p3212_p1), [#allocation4], 4294965248  ;;  %s1894_s26 = sshll.u32 %s248_s22, 9  ;;  %s247_s27 = scalar_lea.sflag [#allocation7], %s246_s8 }
  0x69   : > { %s2826_s7 = scalar_lea.vmem [#allocation6], %s1894_s26  ;;  %p3213_p3 = scmp.ne.s32.totalorder %s3206_s23, 0 }
  0x6b   : > { %2611 = dma.done.wait (%p3213_p3), %s247_s27, 12288  }
  0x6c   : > { %2613 = vsyncadd (%p3213_p3), %s247_s27, 4294955008  ;;  %s1895_s21 = sshll.u32 %s248_s22, 8  ;;  %p1896_p2 = scmp.ne.s32.totalorder %s2632_s15, 0 }
  0x6d   : > { %s2832_s25 = scalar_lea.vmem [#allocation8], %s1895_s21  ;;  %v2654_v0 = vmov (!%p1896_p2), 0.0  }
  0x6e   : > { %289 = sbr.rel (%p1896_p2) target bundleno = 126 (0x7e), region = 48  ;;  %290 = vst [vmem:[#allocation2] sm:$0xff] (!%p1896_p2), %v2654_v0  ;;  %291 = vst [vmem:[#allocation2 + $0x8] sm:$0xff] (!%p1896_p2), %v2654_v0 }
  0x6f   : > { %292 = vst [vmem:[#allocation2 + $0x10] sm:$0xff] (!%p1896_p2), %v2654_v0  ;;  %293 = vst [vmem:[#allocation2 + $0x18] sm:$0xff] (!%p1896_p2), %v2654_v0 }
  0x70   : > { %294 = vst [vmem:[#allocation2 + $0x20] sm:$0xff] (!%p1896_p2), %v2654_v0  ;;  %295 = vst [vmem:[#allocation2 + $0x28] sm:$0xff] (!%p1896_p2), %v2654_v0 }
  0x71   : > { %296 = vst [vmem:[#allocation2 + $0x30] sm:$0xff] (!%p1896_p2), %v2654_v0  ;;  %297 = vst [vmem:[#allocation2 + $0x38] sm:$0xff] (!%p1896_p2), %v2654_v0 }
  0x72   : > { %298 = vst [vmem:[#allocation2 + $0x40] sm:$0xff] (!%p1896_p2), %v2654_v0  ;;  %299 = vst [vmem:[#allocation2 + $0x48] sm:$0xff] (!%p1896_p2), %v2654_v0 }
  0x73   : > { %300 = vst [vmem:[#allocation2 + $0x50] sm:$0xff] (!%p1896_p2), %v2654_v0  ;;  %301 = vst [vmem:[#allocation2 + $0x58] sm:$0xff] (!%p1896_p2), %v2654_v0 }
  0x74   : > { %302 = vst [vmem:[#allocation2 + $0x60] sm:$0xff] (!%p1896_p2), %v2654_v0  ;;  %303 = vst [vmem:[#allocation2 + $0x68] sm:$0xff] (!%p1896_p2), %v2654_v0 }
  0x75   : > { %304 = vst [vmem:[#allocation2 + $0x70] sm:$0xff] %v2654_v0  ;;  %305 = vst [vmem:[#allocation2 + $0x78] sm:$0xff] %v2654_v0 }
  0x76   : > { %306 = vst [vmem:[#allocation2 + $0x80] sm:$0xff] %v2654_v0  ;;  %307 = vst [vmem:[#allocation2 + $0x88] sm:$0xff] %v2654_v0 }
  0x77   : > { %308 = vst [vmem:[#allocation2 + $0x90] sm:$0xff] %v2654_v0  ;;  %309 = vst [vmem:[#allocation2 + $0x98] sm:$0xff] %v2654_v0 }
  0x78   : > { %310 = vst [vmem:[#allocation2 + $0xa0] sm:$0xff] %v2654_v0  ;;  %311 = vst [vmem:[#allocation2 + $0xa8] sm:$0xff] %v2654_v0 }
  0x79   : > { %312 = vst [vmem:[#allocation2 + $0xb0] sm:$0xff] %v2654_v0  ;;  %313 = vst [vmem:[#allocation2 + $0xb8] sm:$0xff] %v2654_v0 }
  0x7a   : > { %314 = vst [vmem:[#allocation2 + $0xc0] sm:$0xff] %v2654_v0  ;;  %315 = vst [vmem:[#allocation2 + $0xc8] sm:$0xff] %v2654_v0 }
  0x7b   : > { %316 = vst [vmem:[#allocation2 + $0xd0] sm:$0xff] %v2654_v0  ;;  %317 = vst [vmem:[#allocation2 + $0xd8] sm:$0xff] %v2654_v0 }
  0x7c   : > { %318 = vst [vmem:[#allocation2 + $0xe0] sm:$0xff] %v2654_v0  ;;  %319 = vst [vmem:[#allocation2 + $0xe8] sm:$0xff] %v2654_v0 }
  0x7d   : > { %320 = vst [vmem:[#allocation2 + $0xf0] sm:$0xff] %v2654_v0  ;;  %321 = vst [vmem:[#allocation2 + $0xf8] sm:$0xff] %v2654_v0 }
  0x7e PF: > { %v2204_v1 = vld [vmem:[%s2826_s7 + $0x4] ss:$8 sps:$4 sm:$0xff]   ;;  %v2206_v2 = vld [vmem:[%s2826_s7] ss:$8 sps:$4 sm:$0xff]   ;;  %v2207_v3 = vld [vmem:[%s2826_s7 + $0x14] ss:$8 sps:$4 sm:$0xff]  }
  0x7f   : > { %610 = vmatprep.subr.bf16.mxu0 %v2204_v1  ;;  %v2216_v4 = vld [vmem:[%s2826_s7 + $0x104] ss:$8 sps:$4 sm:$0xff]   ;;  %v2218_v5 = vld [vmem:[%s2826_s7 + $0x100] ss:$8 sps:$4 sm:$0xff]   ;;  %v2209_v6 = vld [vmem:[%s2826_s7 + $0x10] ss:$8 sps:$4 sm:$0xff]  }
  0x80   : > { %611 = vmatpush1.bf16.xpose.msra.mxu0 %v2206_v2  ;;  %v2210_v7 = vld [vmem:[%s2826_s7 + $0x24] ss:$8 sps:$4 sm:$0xff]   ;;  %916 = vmatprep.subr.bf16.mxu1 %v2216_v4  ;;  %v2222_v8 = vld [vmem:[%s2826_s7 + $0x114] ss:$8 sps:$4 sm:$0xff]   ;;  %v2224_v9 = vld [vmem:[%s2826_s7 + $0x110] ss:$8 sps:$4 sm:$0xff]  }
  0x81   : > { %612 = vmatprep.subr.bf16.mxu0 %v2207_v3  ;;  %917 = vmatpush1.bf16.xpose.msra.mxu1 %v2218_v5  ;;  %v2228_v10 = vld [vmem:[%s2826_s7 + $0x124] ss:$8 sps:$4 sm:$0xff]   ;;  %v2212_v11 = vld [vmem:[%s2826_s7 + $0x20] ss:$8 sps:$4 sm:$0xff]   ;;  %v2213_v12 = vld [vmem:[%s2826_s7 + $0x34] ss:$8 sps:$4 sm:$0xff]  }
  0x82   : > { %918 = vmatprep.subr.bf16.mxu1 %v2222_v8  ;;  %v2230_v13 = vld [vmem:[%s2826_s7 + $0x120] ss:$8 sps:$4 sm:$0xff]   ;;  %v2234_v14 = vld [vmem:[%s2826_s7 + $0x134] ss:$8 sps:$4 sm:$0xff]   ;;  %v2215_v15 = vld [vmem:[%s2826_s7 + $0x30] ss:$8 sps:$4 sm:$0xff]  }
  0x83   : > { %v2219_v16 = vld [vmem:[%s2826_s7 + $0x44] ss:$8 sps:$4 sm:$0xff]   ;;  %v2236_v17 = vld [vmem:[%s2826_s7 + $0x130] ss:$8 sps:$4 sm:$0xff]   ;;  %v2221_v19 = vld [vmem:[%s2826_s7 + $0x40] ss:$8 sps:$4 sm:$0xff]  }
  0x84   : > { %v2240_v18 = vld [vmem:[%s2826_s7 + $0x144] ss:$8 sps:$4 sm:$0xff]   ;;  %v2225_v20 = vld [vmem:[%s2826_s7 + $0x54] ss:$8 sps:$4 sm:$0xff]   ;;  %v2242_v21 = vld [vmem:[%s2826_s7 + $0x140] ss:$8 sps:$4 sm:$0xff]  }
  0x85   : > { %v2246_v22 = vld [vmem:[%s2826_s7 + $0x154] ss:$8 sps:$4 sm:$0xff]   ;;  %v2227_v23 = vld [vmem:[%s2826_s7 + $0x50] ss:$8 sps:$4 sm:$0xff]   ;;  %v2293_v24 = vld [vmem:[#allocation3 + $0x4] ss:$8 sps:$4 sm:$0xff]  }
  0x86   : > { %v2231_v25 = vld [vmem:[%s2826_s7 + $0x64] ss:$8 sps:$4 sm:$0xff]   ;;  %642 = vmatprep.mubr.bf16.mxu0 %v2293_v24  ;;  %948 = vmatprep.mubr.bf16.mxu1 %v2293_v24  ;;  %v2248_v26 = vld [vmem:[%s2826_s7 + $0x150] ss:$8 sps:$4 sm:$0xff]   ;;  %v2233_v28 = vld [vmem:[%s2826_s7 + $0x60] ss:$8 sps:$4 sm:$0xff]  }
  0x87   : > { %v2252_v27 = vld [vmem:[%s2826_s7 + $0x164] ss:$8 sps:$4 sm:$0xff]   ;;  %v2237_v29 = vld [vmem:[%s2826_s7 + $0x74] ss:$8 sps:$4 sm:$0xff]   ;;  %v2254_v30 = vld [vmem:[%s2826_s7 + $0x160] ss:$8 sps:$4 sm:$0xff]  }
  0x88   : > { %613 = vmatpush1.bf16.xpose.msra.mxu0 %v2209_v6  ;;  %v2239_v31 = vld [vmem:[%s2826_s7 + $0x70] ss:$8 sps:$4 sm:$0xff]   ;;  %v2258_v32 = vld [vmem:[%s2826_s7 + $0x174] ss:$8 sps:$4 sm:$0xff]   ;;  %v2243_v33 = vld [vmem:[%s2826_s7 + $0x84] ss:$8 sps:$4 sm:$0xff]  }
  0x89   : > { %614 = vmatprep.subr.bf16.mxu0 %v2210_v7  ;;  %919 = vmatpush1.bf16.xpose.msra.mxu1 %v2224_v9  ;;  %v2260_v34 = vld [vmem:[%s2826_s7 + $0x170] ss:$8 sps:$4 sm:$0xff]   ;;  %v2264_v35 = vld [vmem:[%s2826_s7 + $0x184] ss:$8 sps:$4 sm:$0xff]   ;;  %v2245_v36 = vld [vmem:[%s2826_s7 + $0x80] ss:$8 sps:$4 sm:$0xff]  }
  0x8a   : > { %920 = vmatprep.subr.bf16.mxu1 %v2228_v10  ;;  %v2249_v37 = vld [vmem:[%s2826_s7 + $0x94] ss:$8 sps:$4 sm:$0xff]   ;;  %v2266_v38 = vld [vmem:[%s2826_s7 + $0x180] ss:$8 sps:$4 sm:$0xff]   ;;  %v2251_v40 = vld [vmem:[%s2826_s7 + $0x90] ss:$8 sps:$4 sm:$0xff]  }
  0x8b   : > { %v2270_v39 = vld [vmem:[%s2826_s7 + $0x194] ss:$8 sps:$4 sm:$0xff]   ;;  %v2255_v41 = vld [vmem:[%s2826_s7 + $0xa4] ss:$8 sps:$4 sm:$0xff]   ;;  %v2272_v42 = vld [vmem:[%s2826_s7 + $0x190] ss:$8 sps:$4 sm:$0xff]  }
  0x8c   : > { %v2276_v43 = vld [vmem:[%s2826_s7 + $0x1a4] ss:$8 sps:$4 sm:$0xff]   ;;  %v2257_v44 = vld [vmem:[%s2826_s7 + $0xa0] ss:$8 sps:$4 sm:$0xff]   ;;  %v2261_v45 = vld [vmem:[%s2826_s7 + $0xb4] ss:$8 sps:$4 sm:$0xff]  }
  0x8d   : > { %v2278_v46 = vld [vmem:[%s2826_s7 + $0x1a0] ss:$8 sps:$4 sm:$0xff]   ;;  %v2282_v47 = vld [vmem:[%s2826_s7 + $0x1b4] ss:$8 sps:$4 sm:$0xff]   ;;  %v2263_v48 = vld [vmem:[%s2826_s7 + $0xb0] ss:$8 sps:$4 sm:$0xff]  }
  0x8e   : > { %v2267_v49 = vld [vmem:[%s2826_s7 + $0xc4] ss:$8 sps:$4 sm:$0xff]   ;;  %v2284_v50 = vld [vmem:[%s2826_s7 + $0x1b0] ss:$8 sps:$4 sm:$0xff]   ;;  %v2269_v52 = vld [vmem:[%s2826_s7 + $0xc0] ss:$8 sps:$4 sm:$0xff]  }
  0x8f   : > { %v2288_v51 = vld [vmem:[%s2826_s7 + $0x1c4] ss:$8 sps:$4 sm:$0xff]   ;;  %v2273_v53 = vld [vmem:[%s2826_s7 + $0xd4] ss:$8 sps:$4 sm:$0xff]   ;;  %v2290_v54 = vld [vmem:[%s2826_s7 + $0x1c0] ss:$8 sps:$4 sm:$0xff]  }
  0x90   : > { %615 = vmatpush1.bf16.xpose.msra.mxu0 %v2212_v11  ;;  %v2294_v55 = vld [vmem:[%s2826_s7 + $0x1d4] ss:$8 sps:$4 sm:$0xff]   ;;  %v2275_v56 = vld [vmem:[%s2826_s7 + $0xd0] ss:$8 sps:$4 sm:$0xff]   ;;  %v2279_v57 = vld [vmem:[%s2826_s7 + $0xe4] ss:$8 sps:$4 sm:$0xff]  }
  0x91   : > { %616 = vmatprep.subr.bf16.mxu0 %v2213_v12  ;;  %921 = vmatpush1.bf16.xpose.msra.mxu1 %v2230_v13  ;;  %v2296_v58 = vld [vmem:[%s2826_s7 + $0x1d0] ss:$8 sps:$4 sm:$0xff]   ;;  %v2300_v59 = vld [vmem:[%s2826_s7 + $0x1e4] ss:$8 sps:$4 sm:$0xff]   ;;  %v2281_v60 = vld [vmem:[%s2826_s7 + $0xe0] ss:$8 sps:$4 sm:$0xff]  }
  0x92   : > { %922 = vmatprep.subr.bf16.mxu1 %v2234_v14  ;;  %v2285_v61 = vld [vmem:[%s2826_s7 + $0xf4] ss:$8 sps:$4 sm:$0xff]   ;;  %v2302_v62 = vld [vmem:[%s2826_s7 + $0x1e0] ss:$8 sps:$4 sm:$0xff]   ;;  %v2287_v0 = vld [vmem:[%s2826_s7 + $0xf0] ss:$8 sps:$4 sm:$0xff]  }
  0x93   : > { %v2306_v63 = vld [vmem:[%s2826_s7 + $0x1f4] ss:$8 sps:$4 sm:$0xff]   ;;  %v2326_v1 = vld [vmem:[%s2832_s25 + $0x4] ss:$8 sps:$4 sm:$0xff]   ;;  %v2308_v2 = vld [vmem:[%s2826_s7 + $0x1f0] ss:$8 sps:$4 sm:$0xff]  }
  0x94   : > { %v2291_v3 = vld [vmem:[#allocation3] ss:$8 sps:$4 sm:$0xff]   ;;  %v2297_v4 = vld [vmem:[#allocation3 + $0x14] ss:$8 sps:$4 sm:$0xff]   ;;  %v2327_v7 = vld [vmem:[%s2832_s25 + $0x10] ss:$8 sps:$4 sm:$0xff]  }
  0x95   : > { %v2324_v5 = vld [vmem:[%s2832_s25] ss:$8 sps:$4 sm:$0xff]   ;;  %v2329_v6 = vld [vmem:[%s2832_s25 + $0x14] ss:$8 sps:$4 sm:$0xff]   ;;  %v2332_v8 = vld [vmem:[%s2832_s25 + $0x24] ss:$8 sps:$4 sm:$0xff]  }
  0x96   : > { %v2299_v9 = vld [vmem:[#allocation3 + $0x10] ss:$8 sps:$4 sm:$0xff]   ;;  %v2303_v10 = vld [vmem:[#allocation3 + $0x24] ss:$8 sps:$4 sm:$0xff]   ;;  %v2330_v11 = vld [vmem:[%s2832_s25 + $0x20] ss:$8 sps:$4 sm:$0xff]  }
  0x97   : > { %v2335_v12 = vld [vmem:[%s2832_s25 + $0x34] ss:$8 sps:$4 sm:$0xff]   ;;  %v2333_v13 = vld [vmem:[%s2832_s25 + $0x30] ss:$8 sps:$4 sm:$0xff]   ;;  %v2338_v14 = vld [vmem:[%s2832_s25 + $0x44] ss:$8 sps:$4 sm:$0xff]  }
  0x98   : > { %617 = vmatpush1.bf16.xpose.msra.mxu0 %v2215_v15  ;;  %v2305_v15 = vld [vmem:[#allocation3 + $0x20] ss:$8 sps:$4 sm:$0xff]   ;;  %p2073_p4 = scmp.ne.s32.totalorder %s2632_s15, 1 }
  0x99   : > { %618 = vmatprep.subr.bf16.mxu0 %v2219_v16  ;;  %923 = vmatpush1.bf16.xpose.msra.mxu1 %v2236_v17  ;;  %v2309_v16 = vld [vmem:[#allocation3 + $0x34] ss:$8 sps:$4 sm:$0xff]   ;;  %v2336_v17 = vld [vmem:[%s2832_s25 + $0x40] ss:$8 sps:$4 sm:$0xff]  }
  0x9a   : > { %924 = vmatprep.subr.bf16.mxu1 %v2240_v18  ;;  %v2341_v18 = vld [vmem:[%s2832_s25 + $0x54] ss:$8 sps:$4 sm:$0xff]   ;;  %v2314_v24 = vld [vmem:[#allocation3 + $0x40] ss:$8 sps:$4 sm:$0xff]  }
  0xa0   : > { %619 = vmatpush1.bf16.xpose.msra.mxu0 %v2221_v19  ;;  %v2339_v19 = vld [vmem:[%s2832_s25 + $0x50] ss:$8 sps:$4 sm:$0xff]  }
  0xa1   : > { %620 = vmatprep.subr.bf16.mxu0 %v2225_v20  ;;  %925 = vmatpush1.bf16.xpose.msra.mxu1 %v2242_v21  ;;  %v2344_v20 = vld [vmem:[%s2832_s25 + $0x64] ss:$8 sps:$4 sm:$0xff]   ;;  %v2311_v21 = vld [vmem:[#allocation3 + $0x30] ss:$8 sps:$4 sm:$0xff]  }
  0xa2   : > { %926 = vmatprep.subr.bf16.mxu1 %v2246_v22  ;;  %v2312_v22 = vld [vmem:[#allocation3 + $0x44] ss:$8 sps:$4 sm:$0xff]  }
  0xa8   : > { %621 = vmatpush1.bf16.xpose.msra.mxu0 %v2227_v23  ;;  %v2342_v23 = vld [vmem:[%s2832_s25 + $0x60] ss:$8 sps:$4 sm:$0xff]  }
  0xa9   : > { %622 = vmatprep.subr.bf16.mxu0 %v2231_v25  ;;  %927 = vmatpush1.bf16.xpose.msra.mxu1 %v2248_v26  ;;  %v2315_v25 = vld [vmem:[#allocation3 + $0x54] ss:$8 sps:$4 sm:$0xff]   ;;  %v2317_v26 = vld [vmem:[#allocation3 + $0x50] ss:$8 sps:$4 sm:$0xff]  }
  0xaa   : > { %928 = vmatprep.subr.bf16.mxu1 %v2252_v27  ;;  %v2318_v27 = vld [vmem:[#allocation3 + $0x64] ss:$8 sps:$4 sm:$0xff]  }
  0xb0   : > { %623 = vmatpush1.bf16.xpose.msra.mxu0 %v2233_v28  ;;  %v2320_v28 = vld [vmem:[#allocation3 + $0x60] ss:$8 sps:$4 sm:$0xff]  }
  0xb1   : > { %624 = vmatprep.subr.bf16.mxu0 %v2237_v29  ;;  %929 = vmatpush1.bf16.xpose.msra.mxu1 %v2254_v30  ;;  %v2321_v29 = vld [vmem:[#allocation3 + $0x74] ss:$8 sps:$4 sm:$0xff]   ;;  %v2323_v30 = vld [vmem:[#allocation3 + $0x70] ss:$8 sps:$4 sm:$0xff]  }
  0xb2   : > { %930 = vmatprep.subr.bf16.mxu1 %v2258_v32  ;;  %v2345_v32 = vld [vmem:[%s2832_s25 + $0x70] ss:$8 sps:$4 sm:$0xff]  }
  0xb8   : > { %625 = vmatpush1.bf16.xpose.msra.mxu0 %v2239_v31  ;;  %v2347_v31 = vld [vmem:[%s2832_s25 + $0x74] ss:$8 sps:$4 sm:$0xff]  }
  0xb9   : > { %626 = vmatprep.subr.bf16.mxu0 %v2243_v33  ;;  %931 = vmatpush1.bf16.xpose.msra.mxu1 %v2260_v34  ;;  %v2350_v33 = vld [vmem:[%s2832_s25 + $0x84] ss:$8 sps:$4 sm:$0xff]   ;;  %v2348_v34 = vld [vmem:[%s2832_s25 + $0x80] ss:$8 sps:$4 sm:$0xff]  }
  0xba   : > { %932 = vmatprep.subr.bf16.mxu1 %v2264_v35  ;;  %v2353_v35 = vld [vmem:[%s2832_s25 + $0x94] ss:$8 sps:$4 sm:$0xff]  }
  0xc0   : > { %627 = vmatpush1.bf16.xpose.msra.mxu0 %v2245_v36  ;;  %v2351_v36 = vld [vmem:[%s2832_s25 + $0x90] ss:$8 sps:$4 sm:$0xff]  }
  0xc1   : > { %628 = vmatprep.subr.bf16.mxu0 %v2249_v37  ;;  %933 = vmatpush1.bf16.xpose.msra.mxu1 %v2266_v38  ;;  %v2356_v37 = vld [vmem:[%s2832_s25 + $0xa4] ss:$8 sps:$4 sm:$0xff]   ;;  %v2354_v38 = vld [vmem:[%s2832_s25 + $0xa0] ss:$8 sps:$4 sm:$0xff]  }
  0xc2   : > { %934 = vmatprep.subr.bf16.mxu1 %v2270_v39  ;;  %v2359_v39 = vld [vmem:[%s2832_s25 + $0xb4] ss:$8 sps:$4 sm:$0xff]  }
  0xc8   : > { %629 = vmatpush1.bf16.xpose.msra.mxu0 %v2251_v40  ;;  %v2357_v40 = vld [vmem:[%s2832_s25 + $0xb0] ss:$8 sps:$4 sm:$0xff]  }
  0xc9   : > { %630 = vmatprep.subr.bf16.mxu0 %v2255_v41  ;;  %935 = vmatpush1.bf16.xpose.msra.mxu1 %v2272_v42  ;;  %v2362_v41 = vld [vmem:[%s2832_s25 + $0xc4] ss:$8 sps:$4 sm:$0xff]   ;;  %v2360_v42 = vld [vmem:[%s2832_s25 + $0xc0] ss:$8 sps:$4 sm:$0xff]  }
  0xca   : > { %936 = vmatprep.subr.bf16.mxu1 %v2276_v43  ;;  %v2365_v43 = vld [vmem:[%s2832_s25 + $0xd4] ss:$8 sps:$4 sm:$0xff]  }
  0xd0   : > { %631 = vmatpush1.bf16.xpose.msra.mxu0 %v2257_v44  ;;  %v2363_v44 = vld [vmem:[%s2832_s25 + $0xd0] ss:$8 sps:$4 sm:$0xff]  }
  0xd1   : > { %632 = vmatprep.subr.bf16.mxu0 %v2261_v45  ;;  %937 = vmatpush1.bf16.xpose.msra.mxu1 %v2278_v46  ;;  %v2368_v45 = vld [vmem:[%s2832_s25 + $0xe4] ss:$8 sps:$4 sm:$0xff]   ;;  %v2366_v46 = vld [vmem:[%s2832_s25 + $0xe0] ss:$8 sps:$4 sm:$0xff]  }
  0xd2   : > { %938 = vmatprep.subr.bf16.mxu1 %v2282_v47  ;;  %v2371_v47 = vld [vmem:[%s2832_s25 + $0xf4] ss:$8 sps:$4 sm:$0xff]  }
  0xd8   : > { %633 = vmatpush1.bf16.xpose.msra.mxu0 %v2263_v48  ;;  %v2369_v48 = vld [vmem:[%s2832_s25 + $0xf0] ss:$8 sps:$4 sm:$0xff]  }
  0xd9   : > { %634 = vmatprep.subr.bf16.mxu0 %v2267_v49  ;;  %939 = vmatpush1.bf16.xpose.msra.mxu1 %v2284_v50 }
  0xda   : > { %940 = vmatprep.subr.bf16.mxu1 %v2288_v51 }
  0xe0   : > { %635 = vmatpush1.bf16.xpose.msra.mxu0 %v2269_v52 }
  0xe1   : > { %636 = vmatprep.subr.bf16.mxu0 %v2273_v53  ;;  %941 = vmatpush1.bf16.xpose.msra.mxu1 %v2290_v54 }
  0xe2   : > { %942 = vmatprep.subr.bf16.mxu1 %v2294_v55 }
  0xe8   : > { %637 = vmatpush1.bf16.xpose.msra.mxu0 %v2275_v56 }
  0xe9   : > { %638 = vmatprep.subr.bf16.mxu0 %v2279_v57  ;;  %943 = vmatpush1.bf16.xpose.msra.mxu1 %v2296_v58 }
  0xea   : > { %944 = vmatprep.subr.bf16.mxu1 %v2300_v59 }
  0xf0   : > { %639 = vmatpush1.bf16.xpose.msra.mxu0 %v2281_v60 }
  0xf1   : > { %640 = vmatprep.subr.bf16.mxu0 %v2285_v61  ;;  %945 = vmatpush1.bf16.xpose.msra.mxu1 %v2302_v62 }
  0xf2   : > { %946 = vmatprep.subr.bf16.mxu1 %v2306_v63 }
  0xf8   : > { %641 = vmatpush1.bf16.xpose.msra.mxu0 %v2287_v0 }
  0xf9   : > { %1525 = vmatprep.subr.bf16.mxu0 %v2326_v1  ;;  %947 = vmatpush1.bf16.xpose.msra.mxu1 %v2308_v2 }
  0xfa   : > { %2082 = vmatprep.subr.bf16.mxu1 %v2326_v1 }
  0xff   : > { %643 = vmatmul.mubr.bf16.vlgmr.msra.gmra.mrb[0].mxu0 %v2291_v3 }
 0x100   : > { %652 = vmatprep.mubr.bf16.mxu0 %v2297_v4  ;;  %1526 = vmatpush1.bf16.msra.mxu0 %v2324_v5 }
 0x101   : > { %1527 = vmatprep.subr.bf16.mxu0 %v2329_v6  ;;  %949 = vmatmul.mubr.bf16.vlgmr.msra.gmra.mrb[0].mxu1 %v2291_v3 }
 0x102   : > { %958 = vmatprep.mubr.bf16.mxu1 %v2297_v4  ;;  %2098 = vmatpush1.bf16.msra.mxu1 %v2324_v5 }
 0x103   : > { %2083 = vmatprep.subr.bf16.mxu1 %v2329_v6 }
 0x104   : > { %1528 = vmatpush1.bf16.msra.mxu0 %v2327_v7 }
 0x105   : > { %1529 = vmatprep.subr.bf16.mxu0 %v2332_v8 }
 0x106   : > { %2099 = vmatpush1.bf16.msra.mxu1 %v2327_v7 }
 0x107   : > { %653 = vmatmul.mubr.bf16.gmra.mrb[4].mxu0 %v2299_v9  ;;  %2084 = vmatprep.subr.bf16.mxu1 %v2332_v8 }
 0x108   : > { %662 = vmatprep.mubr.bf16.mxu0 %v2303_v10  ;;  %1530 = vmatpush1.bf16.msra.mxu0 %v2330_v11 }
 0x109   : > { %1531 = vmatprep.subr.bf16.mxu0 %v2335_v12  ;;  %959 = vmatmul.mubr.bf16.gmra.mrb[4].mxu1 %v2299_v9 }
 0x10a   : > { %968 = vmatprep.mubr.bf16.mxu1 %v2303_v10  ;;  %2100 = vmatpush1.bf16.msra.mxu1 %v2330_v11 }
 0x10b   : > { %2085 = vmatprep.subr.bf16.mxu1 %v2335_v12 }
 0x10c   : > { %1532 = vmatpush1.bf16.msra.mxu0 %v2333_v13 }
 0x10d   : > { %1533 = vmatprep.subr.bf16.mxu0 %v2338_v14 }
 0x10e   : > { %2101 = vmatpush1.bf16.msra.mxu1 %v2333_v13 }
 0x10f   : > { %663 = vmatmul.mubr.bf16.gmra.mrb[8].mxu0 %v2305_v15  ;;  %2086 = vmatprep.subr.bf16.mxu1 %v2338_v14 }
 0x110   : > { %672 = vmatprep.mubr.bf16.mxu0 %v2309_v16  ;;  %1534 = vmatpush1.bf16.msra.mxu0 %v2336_v17 }
 0x111   : > { %1535 = vmatprep.subr.bf16.mxu0 %v2341_v18  ;;  %969 = vmatmul.mubr.bf16.gmra.mrb[8].mxu1 %v2305_v15 }
 0x112   : > { %978 = vmatprep.mubr.bf16.mxu1 %v2309_v16  ;;  %2102 = vmatpush1.bf16.msra.mxu1 %v2336_v17 }
 0x113   : > { %2087 = vmatprep.subr.bf16.mxu1 %v2341_v18 }
 0x114   : > { %1536 = vmatpush1.bf16.msra.mxu0 %v2339_v19 }
 0x115   : > { %1537 = vmatprep.subr.bf16.mxu0 %v2344_v20 }
 0x116   : > { %2103 = vmatpush1.bf16.msra.mxu1 %v2339_v19 }
 0x117   : > { %673 = vmatmul.mubr.bf16.gmra.mrb[12].mxu0 %v2311_v21  ;;  %2088 = vmatprep.subr.bf16.mxu1 %v2344_v20 }
 0x118   : > { %682 = vmatprep.mubr.bf16.mxu0 %v2312_v22  ;;  %1538 = vmatpush1.bf16.msra.mxu0 %v2342_v23 }
 0x119   : > { %979 = vmatmul.mubr.bf16.gmra.mrb[12].mxu1 %v2311_v21  ;;  %1539 = vmatprep.subr.bf16.mxu0 %v2347_v31 }
 0x11a   : > { %988 = vmatprep.mubr.bf16.mxu1 %v2312_v22  ;;  %2104 = vmatpush1.bf16.msra.mxu1 %v2342_v23 }
 0x11b   : > { %2089 = vmatprep.subr.bf16.mxu1 %v2347_v31 }
 0x11c   : > { %1540 = vmatpush1.bf16.msra.mxu0 %v2345_v32 }
 0x11d   : > { %1541 = vmatprep.subr.bf16.mxu0 %v2350_v33 }
 0x11e   : > { %2105 = vmatpush1.bf16.msra.mxu1 %v2345_v32 }
 0x11f   : > { %683 = vmatmul.mubr.bf16.gmra.mrb[16].mxu0 %v2314_v24  ;;  %2090 = vmatprep.subr.bf16.mxu1 %v2350_v33 }
 0x120   : > { %692 = vmatprep.mubr.bf16.mxu0 %v2315_v25  ;;  %1542 = vmatpush1.bf16.msra.mxu0 %v2348_v34 }
 0x121   : > { %989 = vmatmul.mubr.bf16.gmra.mrb[16].mxu1 %v2314_v24  ;;  %1543 = vmatprep.subr.bf16.mxu0 %v2353_v35 }
 0x122   : > { %998 = vmatprep.mubr.bf16.mxu1 %v2315_v25  ;;  %2106 = vmatpush1.bf16.msra.mxu1 %v2348_v34 }
 0x123   : > { %2091 = vmatprep.subr.bf16.mxu1 %v2353_v35 }
 0x124   : > { %1544 = vmatpush1.bf16.msra.mxu0 %v2351_v36 }
 0x125   : > { %1545 = vmatprep.subr.bf16.mxu0 %v2356_v37 }
 0x126   : > { %2107 = vmatpush1.bf16.msra.mxu1 %v2351_v36 }
 0x127   : > { %693 = vmatmul.mubr.bf16.gmra.mrb[20].mxu0 %v2317_v26  ;;  %2092 = vmatprep.subr.bf16.mxu1 %v2356_v37 }
 0x128   : > { %702 = vmatprep.mubr.bf16.mxu0 %v2318_v27  ;;  %1546 = vmatpush1.bf16.msra.mxu0 %v2354_v38 }
 0x129   : > { %999 = vmatmul.mubr.bf16.gmra.mrb[20].mxu1 %v2317_v26  ;;  %1547 = vmatprep.subr.bf16.mxu0 %v2359_v39 }
 0x12a   : > { %1008 = vmatprep.mubr.bf16.mxu1 %v2318_v27  ;;  %2108 = vmatpush1.bf16.msra.mxu1 %v2354_v38 }
 0x12b   : > { %2093 = vmatprep.subr.bf16.mxu1 %v2359_v39 }
 0x12c   : > { %1548 = vmatpush1.bf16.msra.mxu0 %v2357_v40 }
 0x12d   : > { %1549 = vmatprep.subr.bf16.mxu0 %v2362_v41 }
 0x12e   : > { %2109 = vmatpush1.bf16.msra.mxu1 %v2357_v40 }
 0x12f   : > { %703 = vmatmul.mubr.bf16.gmra.mrb[24].mxu0 %v2320_v28  ;;  %2094 = vmatprep.subr.bf16.mxu1 %v2362_v41 }
 0x130   : > { %712 = vmatprep.mubr.bf16.mxu0 %v2321_v29  ;;  %1550 = vmatpush1.bf16.msra.mxu0 %v2360_v42 }
 0x131   : > { %1009 = vmatmul.mubr.bf16.gmra.mrb[24].mxu1 %v2320_v28  ;;  %1551 = vmatprep.subr.bf16.mxu0 %v2365_v43 }
 0x132   : > { %1018 = vmatprep.mubr.bf16.mxu1 %v2321_v29  ;;  %2110 = vmatpush1.bf16.msra.mxu1 %v2360_v42 }
 0x133   : > { %2095 = vmatprep.subr.bf16.mxu1 %v2365_v43 }
 0x134   : > { %1552 = vmatpush1.bf16.msra.mxu0 %v2363_v44 }
 0x135   : > { %1553 = vmatprep.subr.bf16.mxu0 %v2368_v45 }
 0x136   : > { %2111 = vmatpush1.bf16.msra.mxu1 %v2363_v44 }
 0x137   : > { %713 = vmatmul.mubr.bf16.gmra.mrb[28].mxu0 %v2323_v30  ;;  %2096 = vmatprep.subr.bf16.mxu1 %v2368_v45 }
 0x138   : > { %1554 = vmatpush1.bf16.msra.mxu0 %v2366_v46 }
 0x139   : > { %1019 = vmatmul.mubr.bf16.gmra.mrb[28].mxu1 %v2323_v30  ;;  %1555 = vmatprep.subr.bf16.mxu0 %v2371_v47 }
 0x13a   : > { %2112 = vmatpush1.bf16.msra.mxu1 %v2366_v46 }
 0x13b   : > { %2097 = vmatprep.subr.bf16.mxu1 %v2371_v47 }
 0x13c   : > { %1556 = vmatpush1.bf16.msra.mxu0 %v2369_v48 }
 0x13e   : > { %2113 = vmatpush1.bf16.msra.mxu1 %v2369_v48 }
 0x1d2   : > { %v2931_v49 = vpop.f32.mrb[0].mxu0 }
 0x1d3   : > { %v2009_v50 = vmul.f32 -1.442695, %v2931_v49  ;;  %v2934_v51 = vpop.f32.mrb[1].mxu0 }
 0x1d4   : > { %v2010_v52 = vmul.f32 -1.442695, %v2934_v51  ;;  %v2937_v53 = vpop.f32.mrb[2].mxu0  ;;  %v2943_v57 = vpop.f32.mrb[0].mxu1 }
 0x1d5   : > { %2372 = vpow2.f32 %v2009_v50  ;;  %v2011_v54 = vmul.f32 -1.442695, %v2937_v53  ;;  %v2940_v55 = vpop.f32.mrb[3].mxu0  ;;  %v2945_v58 = vpop.f32.mrb[1].mxu1 }
 0x1d6   : > { %2374 = vpow2.f32 %v2010_v52  ;;  %v2012_v56 = vmul.f32 -1.442695, %v2940_v55  ;;  %v2949_v60 = vpop.f32.mrb[2].mxu1 }
 0x1d7   : > { %2376 = vpow2.f32 %v2011_v54  ;;  %v2954_v63 = vpop.f32.mrb[3].mxu1 }
 0x1d8   : > { %2378 = vpow2.f32 %v2012_v56 }
 0x1da   : > { %v2947_v59 = vpop.f32.mrb[4].mxu0 }
 0x1db   : > { %v2013_v61 = vmul.f32 -1.442695, %v2947_v59  ;;  %v2952_v62 = vpop.f32.mrb[5].mxu0 }
 0x1dc   : > { %v2014_v0 = vmul.f32 -1.442695, %v2952_v62  ;;  %v2957_v1 = vpop.f32.mrb[6].mxu0  ;;  %v2963_v8 = vpop.f32.mrb[4].mxu1 }
 0x1dd   : > { %2380 = vpow2.f32 %v2013_v61  ;;  %v2015_v2 = vmul.f32 -1.442695, %v2957_v1  ;;  %v2960_v3 = vpop.f32.mrb[7].mxu0  ;;  %v2965_v11 = vpop.f32.mrb[5].mxu1 }
 0x1de   : > { %2382 = vpow2.f32 %v2014_v0  ;;  %v2016_v4 = vmul.f32 -1.442695, %v2960_v3  ;;  %v2969_v15 = vpop.f32.mrb[6].mxu1 }
 0x1df   : > { %v2373_v5 = vpop.eup %2372  ;;  %2384 = vpow2.f32 %v2015_v2  ;;  %v2974_v19 = vpop.f32.mrb[7].mxu1 }
 0x1e0   : > { %v2375_v6 = vpop.eup %2374  ;;  %v1125_v7 = vadd.f32 1.0, %v2373_v5  ;;  %2386 = vpow2.f32 %v2016_v4 }
 0x1e1   : > { %v2377_v9 = vpop.eup %2376  ;;  %v1126_v10 = vadd.f32 1.0, %v2375_v6 }
 0x1e2   : > { %v2379_v12 = vpop.eup %2378  ;;  %2388 = vrcp.f32 %v1125_v7  ;;  %v1127_v13 = vadd.f32 1.0, %v2377_v9  ;;  %v2967_v14 = vpop.f32.mrb[8].mxu0 }
 0x1e3   : > { %2390 = vrcp.f32 %v1126_v10  ;;  %v1128_v16 = vadd.f32 1.0, %v2379_v12  ;;  %v2017_v17 = vmul.f32 -1.442695, %v2967_v14  ;;  %v2972_v18 = vpop.f32.mrb[9].mxu0 }
 0x1e4   : > { %2392 = vrcp.f32 %v1127_v13  ;;  %v2018_v20 = vmul.f32 -1.442695, %v2972_v18  ;;  %v2977_v21 = vpop.f32.mrb[10].mxu0  ;;  %v2983_v28 = vpop.f32.mrb[8].mxu1 }
 0x1e5   : > { %2394 = vrcp.f32 %v1128_v16  ;;  %v2019_v22 = vmul.f32 -1.442695, %v2977_v21  ;;  %v2980_v23 = vpop.f32.mrb[11].mxu0  ;;  %v2985_v31 = vpop.f32.mrb[9].mxu1 }
 0x1e6   : > { %2396 = vpow2.f32 %v2017_v17  ;;  %v2020_v24 = vmul.f32 -1.442695, %v2980_v23  ;;  %v2989_v35 = vpop.f32.mrb[10].mxu1 }
 0x1e7   : > { %v2381_v25 = vpop.eup %2380  ;;  %2398 = vpow2.f32 %v2018_v20  ;;  %v2994_v39 = vpop.f32.mrb[11].mxu1 }
 0x1e8   : > { %v2383_v26 = vpop.eup %2382  ;;  %v1129_v27 = vadd.f32 1.0, %v2381_v25  ;;  %2400 = vpow2.f32 %v2019_v22 }
 0x1e9   : > { %v2385_v29 = vpop.eup %2384  ;;  %v1130_v30 = vadd.f32 1.0, %v2383_v26  ;;  %2402 = vpow2.f32 %v2020_v24 }
 0x1ea   : > { %v2387_v32 = vpop.eup %2386  ;;  %2404 = vrcp.f32 %v1129_v27  ;;  %v1131_v33 = vadd.f32 1.0, %v2385_v29  ;;  %v2987_v34 = vpop.f32.mrb[12].mxu0 }
 0x1eb   : > { %2406 = vrcp.f32 %v1130_v30  ;;  %v1132_v36 = vadd.f32 1.0, %v2387_v32  ;;  %v2021_v37 = vmul.f32 -1.442695, %v2987_v34  ;;  %v2992_v38 = vpop.f32.mrb[13].mxu0 }
 0x1ec   : > { %v2389_v40 = vpop.eup %2388  ;;  %2408 = vrcp.f32 %v1131_v33  ;;  %v2022_v41 = vmul.f32 -1.442695, %v2992_v38  ;;  %v2997_v42 = vpop.f32.mrb[14].mxu0 }
 0x1ed   : > { %v2391_v43 = vpop.eup %2390  ;;  %v1221_v44 = vmul.f32 %v2389_v40, %v2931_v49  ;;  %2410 = vrcp.f32 %v1132_v36  ;;  %v2023_v45 = vmul.f32 -1.442695, %v2997_v42  ;;  %v3001_v46 = vpop.f32.mrb[15].mxu0 }
 0x1ee   : > { %v2393_v47 = vpop.eup %2392  ;;  %v1222_v48 = vmul.f32 %v2391_v43, %v2934_v51  ;;  %2412 = vpow2.f32 %v2021_v37  ;;  %v2024_v50 = vmul.f32 -1.442695, %v3001_v46  ;;  %v3009_v2 = vpop.f32.mrb[12].mxu1 }
 0x1ef   : > { %v2395_v52 = vpop.eup %2394  ;;  %v1223_v54 = vmul.f32 %v2393_v47, %v2937_v53  ;;  %2414 = vpow2.f32 %v2022_v41  ;;  %v1253_v56 = vmul.f32 %v1221_v44, %v2943_v57  ;;  %v3012_v6 = vpop.f32.mrb[13].mxu1 }
 0x1f0   : > { %v2397_v61 = vpop.eup %2396  ;;  %v1224_v49 = vmul.f32 %v2395_v52, %v2940_v55  ;;  %2416 = vpow2.f32 %v2023_v45  ;;  %v1254_v0 = vmul.f32 %v1222_v48, %v2945_v58  ;;  %v3017_v10 = vpop.f32.mrb[14].mxu1 }
 0x1f1   : > { %v2399_v4 = vpop.eup %2398  ;;  %v1133_v5 = vadd.f32 1.0, %v2397_v61  ;;  %2418 = vpow2.f32 %v2024_v50  ;;  %v1255_v51 = vmul.f32 %v1223_v54, %v2949_v60  ;;  %v3022_v17 = vpop.f32.mrb[15].mxu1 }
 0x1f2   : > { %v2401_v7 = vpop.eup %2400  ;;  %v1134_v53 = vadd.f32 1.0, %v2399_v4  ;;  %v1256_v9 = vmul.f32 %v1224_v49, %v2954_v63  ;;  %v3015_v57 = vpop.f32.mrb[16].mxu0 }
 0x1f3   : > { %v2403_v55 = vpop.eup %2402  ;;  %2420 = vrcp.f32 %v1133_v5  ;;  %v1135_v58 = vadd.f32 1.0, %v2401_v7  ;;  %v1285_v12 = vpack.c.bf16 %v1255_v51, %v1253_v56  ;;  %v2025_v13 = vmul.f32 -1.442695, %v3015_v57  ;;  %v3020_v16 = vpop.f32.mrb[17].mxu0 }
 0x1f4   : > { %v2405_v60 = vpop.eup %2404  ;;  %2422 = vrcp.f32 %v1134_v53  ;;  %v1136_v20 = vadd.f32 1.0, %v2403_v55  ;;  %v1286_v22 = vpack.c.bf16 %v1256_v9, %v1254_v0  ;;  %v2026_v63 = vmul.f32 -1.442695, %v3020_v16  ;;  %v3025_v24 = vpop.f32.mrb[18].mxu0 }
 0x1f5   : > { %v2407_v25 = vpop.eup %2406  ;;  %v1225_v26 = vmul.f32 %v2405_v60, %v2947_v59  ;;  %2424 = vrcp.f32 %v1135_v58  ;;  %v2027_v27 = vmul.f32 -1.442695, %v3025_v24  ;;  %v3029_v29 = vpop.f32.mrb[19].mxu0 }
 0x1f6   : > { %v2409_v30 = vpop.eup %2408  ;;  %v1226_v32 = vmul.f32 %v2407_v25, %v2952_v62  ;;  %2426 = vrcp.f32 %v1136_v20  ;;  %v2028_v33 = vmul.f32 -1.442695, %v3029_v29  ;;  %1557 = vmatprep.mubr.bf16.mxu0 %v1286_v22  ;;  %v3037_v44 = vpop.f32.mrb[16].mxu1 }
 0x1f7   : > { %v2411_v36 = vpop.eup %2410  ;;  %v1227_v37 = vmul.f32 %v2409_v30, %v2957_v1  ;;  %2428 = vpow2.f32 %v2025_v13  ;;  %v1257_v40 = vmul.f32 %v1225_v26, %v2963_v8  ;;  %1558 = vmatmul.mubr.bf16.vlgmr.msra.gmra.mrb[32].mxu0 %v1285_v12  ;;  %v3040_v48 = vpop.f32.mrb[17].mxu1 }
 0x1f8   : > { %v2413_v59 = vpop.eup %2412  ;;  %v1228_v41 = vmul.f32 %v2411_v36, %v2960_v3  ;;  %2430 = vpow2.f32 %v2026_v63  ;;  %v1258_v43 = vmul.f32 %v1226_v32, %v2965_v11  ;;  %v3045_v3 = vpop.f32.mrb[18].mxu1 }
 0x1f9   : > { %v2415_v62 = vpop.eup %2414  ;;  %v1137_v45 = vadd.f32 1.0, %v2413_v59  ;;  %2432 = vpow2.f32 %v2027_v27  ;;  %v1259_v47 = vmul.f32 %v1227_v37, %v2969_v15  ;;  %v3050_v15 = vpop.f32.mrb[19].mxu1 }
 0x1fa   : > { %v2417_v1 = vpop.eup %2416  ;;  %v1138_v50 = vadd.f32 1.0, %v2415_v62  ;;  %2434 = vpow2.f32 %v2028_v33  ;;  %v1260_v8 = vmul.f32 %v1228_v41, %v2974_v19  ;;  %v3043_v52 = vpop.f32.mrb[20].mxu0 }
 0x1fb   : > { %v2419_v54 = vpop.eup %2418  ;;  %2436 = vrcp.f32 %v1137_v45  ;;  %v1139_v11 = vadd.f32 1.0, %v2417_v1  ;;  %v1287_v56 = vpack.c.bf16 %v1259_v47, %v1257_v40  ;;  %v2029_v61 = vmul.f32 -1.442695, %v3043_v52  ;;  %v3048_v49 = vpop.f32.mrb[21].mxu0 }
 0x1fc   : > { %2438 = vrcp.f32 %v1138_v50  ;;  %v1140_v0 = vadd.f32 1.0, %v2419_v54  ;;  %v1288_v4 = vpack.c.bf16 %v1260_v8, %v1258_v43  ;;  %v2030_v5 = vmul.f32 -1.442695, %v3048_v49  ;;  %v3053_v19 = vpop.f32.mrb[22].mxu0  ;;  %v3063_v63 = vpop.f32.mrb[20].mxu1 }
 0x1fd   : > { %v2421_v51 = vpop.eup %2420  ;;  %2440 = vrcp.f32 %v1139_v11  ;;  %v2031_v7 = vmul.f32 -1.442695, %v3053_v19  ;;  %v3056_v53 = vpop.f32.mrb[23].mxu0 }
 0x1fe   : > { %v2423_v9 = vpop.eup %2422  ;;  %v1229_v55 = vmul.f32 %v2421_v51, %v2967_v14  ;;  %2442 = vrcp.f32 %v1140_v0  ;;  %v2032_v58 = vmul.f32 -1.442695, %v3056_v53  ;;  %1567 = vmatprep.mubr.bf16.mxu0 %v1288_v4  ;;  %v3067_v27 = vpop.f32.mrb[21].mxu1 }
 0x1ff   : > { %v2425_v12 = vpop.eup %2424  ;;  %v1230_v13 = vmul.f32 %v2423_v9, %v2972_v18  ;;  %2444 = vpow2.f32 %v2029_v61  ;;  %1568 = vmatmul.mubr.bf16.gmra.mrb[36].mxu0 %v1287_v56 }
 0x200   : > { %v2427_v60 = vpop.eup %2426  ;;  %v1231_v20 = vmul.f32 %v2425_v12, %v2977_v21  ;;  %2446 = vpow2.f32 %v2030_v5  ;;  %v1261_v22 = vmul.f32 %v1229_v55, %v2983_v28  ;;  %v3072_v21 = vpop.f32.mrb[22].mxu1 }
 0x201   : > { %v2429_v25 = vpop.eup %2428  ;;  %v1232_v14 = vmul.f32 %v2427_v60, %v2980_v23  ;;  %2448 = vpow2.f32 %v2031_v7  ;;  %v1262_v26 = vmul.f32 %v1230_v13, %v2985_v31  ;;  %v3077_v23 = vpop.f32.mrb[23].mxu1 }
 0x202   : > { %v2431_v30 = vpop.eup %2430  ;;  %v1141_v18 = vadd.f32 1.0, %v2429_v25  ;;  %2450 = vpow2.f32 %v2032_v58  ;;  %v1263_v32 = vmul.f32 %v1231_v20, %v2989_v35  ;;  %v3070_v33 = vpop.f32.mrb[24].mxu0 }
 0x203   : > { %v2433_v28 = vpop.eup %2432  ;;  %v1142_v36 = vadd.f32 1.0, %v2431_v30  ;;  %v1264_v37 = vmul.f32 %v1232_v14, %v2994_v39  ;;  %v3075_v40 = vpop.f32.mrb[25].mxu0  ;;  %v2033_v43 = vmul.f32 -1.442695, %v3070_v33 }
 0x204   : > { %v2435_v31 = vpop.eup %2434  ;;  %2452 = vrcp.f32 %v1141_v18  ;;  %v1143_v59 = vadd.f32 1.0, %v2433_v28  ;;  %v1289_v41 = vpack.c.bf16 %v1263_v32, %v1261_v22  ;;  %v3080_v62 = vpop.f32.mrb[26].mxu0  ;;  %v2034_v1 = vmul.f32 -1.442695, %v3075_v40 }
 0x205   : > { %v2437_v35 = vpop.eup %2436  ;;  %2454 = vrcp.f32 %v1142_v36  ;;  %v1144_v45 = vadd.f32 1.0, %v2435_v31  ;;  %v1290_v47 = vpack.c.bf16 %v1264_v37, %v1262_v26  ;;  %v3083_v50 = vpop.f32.mrb[27].mxu0  ;;  %v2035_v54 = vmul.f32 -1.442695, %v3080_v62 }
 0x206   : > { %v2439_v39 = vpop.eup %2438  ;;  %v1233_v8 = vmul.f32 %v2437_v35, %v2987_v34  ;;  %2456 = vrcp.f32 %v1143_v59  ;;  %v2036_v61 = vmul.f32 -1.442695, %v3083_v50  ;;  %v3091_v51 = vpop.f32.mrb[24].mxu1 }
 0x207   : > { %v2441_v11 = vpop.eup %2440  ;;  %v1234_v56 = vmul.f32 %v2439_v39, %v2992_v38  ;;  %2458 = vrcp.f32 %v1144_v45  ;;  %1577 = vmatprep.mubr.bf16.mxu0 %v1290_v47  ;;  %v3095_v38 = vpop.f32.mrb[25].mxu1 }
 0x208   : > { %v2443_v0 = vpop.eup %2442  ;;  %v1235_v4 = vmul.f32 %v2441_v11, %v2997_v42  ;;  %2460 = vpow2.f32 %v2033_v43  ;;  %v1265_v5 = vmul.f32 %v1233_v8, %v3009_v2  ;;  %1578 = vmatmul.mubr.bf16.gmra.mrb[40].mxu0 %v1289_v41  ;;  %v3100_v13 = vpop.f32.mrb[26].mxu1 }
 0x209   : > { %v2445_v34 = vpop.eup %2444  ;;  %v1236_v7 = vmul.f32 %v2443_v0, %v3001_v46  ;;  %2462 = vpow2.f32 %v2034_v1  ;;  %v1266_v9 = vmul.f32 %v1234_v56, %v3012_v6  ;;  %v3105_v22 = vpop.f32.mrb[27].mxu1 }
 0x20a   : > { %v2447_v55 = vpop.eup %2446  ;;  %v1145_v58 = vadd.f32 1.0, %v2445_v34  ;;  %2464 = vpow2.f32 %v2035_v54  ;;  %v1267_v12 = vmul.f32 %v1235_v4, %v3017_v10  ;;  %v3098_v42 = vpop.f32.mrb[28].mxu0 }
 0x20b   : > { %v2449_v2 = vpop.eup %2448  ;;  %v1146_v60 = vadd.f32 1.0, %v2447_v55  ;;  %2466 = vpow2.f32 %v2036_v61  ;;  %v1268_v20 = vmul.f32 %v1236_v7, %v3022_v17  ;;  %v3103_v46 = vpop.f32.mrb[29].mxu0  ;;  %v2037_v26 = vmul.f32 -1.442695, %v3098_v42 }
 0x20c   : > { %v2451_v6 = vpop.eup %2450  ;;  %2468 = vrcp.f32 %v1145_v58  ;;  %v1147_v25 = vadd.f32 1.0, %v2449_v2  ;;  %v1291_v14 = vpack.c.bf16 %v1267_v12, %v1265_v5  ;;  %v3108_v10 = vpop.f32.mrb[30].mxu0  ;;  %v2038_v32 = vmul.f32 -1.442695, %v3103_v46 }
 0x20d   : > { %2470 = vrcp.f32 %v1146_v60  ;;  %v1148_v30 = vadd.f32 1.0, %v2451_v6  ;;  %v1292_v18 = vpack.c.bf16 %v1268_v20, %v1266_v9  ;;  %v3111_v28 = vpop.f32.mrb[31].mxu0  ;;  %v2039_v36 = vmul.f32 -1.442695, %v3108_v10  ;;  %v3117_v35 = vpop.f32.mrb[28].mxu1 }
 0x20e   : > { %v2453_v17 = vpop.eup %2452  ;;  %2472 = vrcp.f32 %v1147_v25  ;;  %v2040_v59 = vmul.f32 -1.442695, %v3111_v28  ;;  %v3121_v39 = vpop.f32.mrb[29].mxu1 }
 0x20f   : > { %v2455_v37 = vpop.eup %2454  ;;  %v1237_v31 = vmul.f32 %v2453_v17, %v3015_v57  ;;  %2474 = vrcp.f32 %v1148_v30  ;;  %1587 = vmatprep.mubr.bf16.mxu0 %v1292_v18  ;;  %v3125_v11 = vpop.f32.mrb[30].mxu1 }
 0x210   : > { %v2457_v41 = vpop.eup %2456  ;;  %v1238_v43 = vmul.f32 %v2455_v37, %v3020_v16  ;;  %2476 = vpow2.f32 %v2037_v26  ;;  %1588 = vmatmul.mubr.bf16.gmra.mrb[44].mxu0 %v1291_v14  ;;  %v3128_v0 = vpop.f32.mrb[31].mxu1 }
 0x211   : > { %v2459_v45 = vpop.eup %2458  ;;  %v1239_v47 = vmul.f32 %v2457_v41, %v3025_v24  ;;  %2478 = vpow2.f32 %v2038_v32  ;;  %v1269_v1 = vmul.f32 %v1237_v31, %v3037_v44 }
 0x212   : > { %v2461_v57 = vpop.eup %2460  ;;  %v1240_v8 = vmul.f32 %v2459_v45, %v3029_v29  ;;  %2480 = vpow2.f32 %v2039_v36  ;;  %v1270_v54 = vmul.f32 %v1238_v43, %v3040_v48 }
 0x213   : > { %v2463_v16 = vpop.eup %2462  ;;  %v1149_v56 = vadd.f32 1.0, %v2461_v57  ;;  %2482 = vpow2.f32 %v2040_v59  ;;  %v1271_v61 = vmul.f32 %v1239_v47, %v3045_v3 }
 0x214   : > { %v2465_v24 = vpop.eup %2464  ;;  %v1150_v4 = vadd.f32 1.0, %v2463_v16  ;;  %v1272_v44 = vmul.f32 %v1240_v8, %v3050_v15 }
 0x215   : > { %v2467_v5 = vpop.eup %2466  ;;  %2484 = vrcp.f32 %v1149_v56  ;;  %v1151_v34 = vadd.f32 1.0, %v2465_v24  ;;  %v1293_v29 = vpack.c.bf16 %v1271_v61, %v1269_v1 }
 0x216   : > { %v2469_v7 = vpop.eup %2468  ;;  %2486 = vrcp.f32 %v1150_v4  ;;  %v1152_v48 = vadd.f32 1.0, %v2467_v5  ;;  %v1294_v9 = vpack.c.bf16 %v1272_v44, %v1270_v54  ;;  %v1302_v4 = vld [vmem:[#allocation2 + $0x8] sm:$0xff]  ;;  %v1303_v5 = vld [vmem:[#allocation2 + $0x10] sm:$0xff] }
 0x217   : > { %v2471_v55 = vpop.eup %2470  ;;  %v1241_v58 = vmul.f32 %v2469_v7, %v3043_v52  ;;  %2488 = vrcp.f32 %v1151_v34 }
 0x218   : > { %v2473_v12 = vpop.eup %2472  ;;  %v1242_v3 = vmul.f32 %v2471_v55, %v3048_v49  ;;  %2490 = vrcp.f32 %v1152_v48  ;;  %1597 = vmatprep.mubr.bf16.mxu1 %v1294_v9  ;;  %v1306_v48 = vld [vmem:[#allocation2 + $0x28] sm:$0xff]  ;;  %v1307_v55 = vld [vmem:[#allocation2 + $0x30] sm:$0xff] }
 0x219   : > { %v2475_v2 = vpop.eup %2474  ;;  %v1243_v15 = vmul.f32 %v2473_v12, %v3053_v19  ;;  %v1273_v60 = vmul.f32 %v1241_v58, %v3063_v63  ;;  %1598 = vmatmul.mubr.bf16.vlgmr.msra.gmra.mrb[32].mxu1 %v1293_v29 }
 0x21a   : > { %v2477_v20 = vpop.eup %2476  ;;  %v1244_v6 = vmul.f32 %v2475_v2, %v3056_v53  ;;  %v1274_v25 = vmul.f32 %v1242_v3, %v3067_v27  ;;  %v1308_v3 = vld [vmem:[#allocation2 + $0x38] sm:$0xff] }
 0x21b   : > { %v2479_v14 = vpop.eup %2478  ;;  %v1153_v26 = vadd.f32 1.0, %v2477_v20  ;;  %v1275_v52 = vmul.f32 %v1243_v15, %v3072_v21 }
 0x21c   : > { %v2481_v30 = vpop.eup %2480  ;;  %v1154_v18 = vadd.f32 1.0, %v2479_v14  ;;  %v1276_v49 = vmul.f32 %v1244_v6, %v3077_v23  ;;  %v1310_v14 = vld [vmem:[#allocation2 + $0x48] sm:$0xff] }
 0x21d   : > { %v2483_v32 = vpop.eup %2482  ;;  %2492 = vrcp.f32 %v1153_v26  ;;  %v1155_v17 = vadd.f32 1.0, %v2481_v30  ;;  %v1295_v19 = vpack.c.bf16 %v1275_v52, %v1273_v60  ;;  %v1311_v52 = vld [vmem:[#allocation2 + $0x50] sm:$0xff] }
 0x21e   : > { %2494 = vrcp.f32 %v1154_v18  ;;  %v1156_v63 = vadd.f32 1.0, %v2483_v32  ;;  %v1296_v36 = vpack.c.bf16 %v1276_v49, %v1274_v25  ;;  %v1309_v25 = vld [vmem:[#allocation2 + $0x40] sm:$0xff]  ;;  %v1312_v49 = vld [vmem:[#allocation2 + $0x58] sm:$0xff] }
 0x21f   : > { %v2485_v37 = vpop.eup %2484  ;;  %2496 = vrcp.f32 %v1155_v17 }
 0x220   : > { %v2487_v53 = vpop.eup %2486  ;;  %v1245_v27 = vmul.f32 %v2485_v37, %v3070_v33  ;;  %2498 = vrcp.f32 %v1156_v63  ;;  %1607 = vmatprep.mubr.bf16.mxu1 %v1296_v36  ;;  %v1313_v37 = vld [vmem:[#allocation2 + $0x60] sm:$0xff] }
 0x221   : > { %v2489_v31 = vpop.eup %2488  ;;  %v1246_v21 = vmul.f32 %v2487_v53, %v3075_v40  ;;  %1608 = vmatmul.mubr.bf16.gmra.mrb[36].mxu1 %v1295_v19  ;;  %v1314_v53 = vld [vmem:[#allocation2 + $0x68] sm:$0xff] }
 0x222   : > { %v2491_v59 = vpop.eup %2490  ;;  %v1247_v23 = vmul.f32 %v2489_v31, %v3080_v62  ;;  %v1277_v41 = vmul.f32 %v1245_v27, %v3091_v51  ;;  %v1315_v31 = vld [vmem:[#allocation2 + $0x70] sm:$0xff] }
 0x223   : > { %v1248_v43 = vmul.f32 %v2491_v59, %v3083_v50  ;;  %v1278_v45 = vmul.f32 %v1246_v21, %v3095_v38 }
 0x224   : > { %v1279_v47 = vmul.f32 %v1247_v23, %v3100_v13  ;;  %v1316_v23 = vld [vmem:[#allocation2 + $0x78] sm:$0xff] }
 0x225   : > { %v1280_v1 = vmul.f32 %v1248_v43, %v3105_v22 }
 0x226   : > { %v1297_v33 = vpack.c.bf16 %v1279_v47, %v1277_v41 }
 0x227   : > { %v2493_v57 = vpop.eup %2492  ;;  %v1298_v8 = vpack.c.bf16 %v1280_v1, %v1278_v45 }
 0x228   : > { %v2495_v54 = vpop.eup %2494  ;;  %v1249_v40 = vmul.f32 %v2493_v57, %v3098_v42  ;;  %v1318_v57 = vld [vmem:[#allocation2 + $0x88] sm:$0xff] }
 0x229   : > { %v2497_v16 = vpop.eup %2496  ;;  %v1250_v56 = vmul.f32 %v2495_v54, %v3103_v46  ;;  %1617 = vmatprep.mubr.bf16.mxu1 %v1298_v8  ;;  %v1301_v46 = vld [vmem:[#allocation2] sm:$0xff]  ;;  %v1319_v54 = vld [vmem:[#allocation2 + $0x90] sm:$0xff] }
 0x22a   : > { %v2499_v62 = vpop.eup %2498  ;;  %v1251_v51 = vmul.f32 %v2497_v16, %v3108_v10  ;;  %v1281_v50 = vmul.f32 %v1249_v40, %v3117_v35  ;;  %1618 = vmatmul.mubr.bf16.gmra.mrb[40].mxu1 %v1297_v33  ;;  %v1304_v35 = vld [vmem:[#allocation2 + $0x18] sm:$0xff]  ;;  %v1317_v33 = vld [vmem:[#allocation2 + $0x80] sm:$0xff] }
 0x22b   : > { %v1252_v38 = vmul.f32 %v2499_v62, %v3111_v28  ;;  %v1282_v13 = vmul.f32 %v1250_v56, %v3121_v39  ;;  %v1320_v56 = vld [vmem:[#allocation2 + $0x98] sm:$0xff] }
 0x22c   : > { %v1283_v22 = vmul.f32 %v1251_v51, %v3125_v11 }
 0x22d   : > { %v1284_v61 = vmul.f32 %v1252_v38, %v3128_v0  ;;  %v1305_v0 = vld [vmem:[#allocation2 + $0x20] sm:$0xff] }
 0x22e   : > { %v1299_v24 = vpack.c.bf16 %v1283_v22, %v1281_v50  ;;  %v1321_v22 = vld [vmem:[#allocation2 + $0xa0] sm:$0xff] }
 0x22f   : > { %v1300_v42 = vpack.c.bf16 %v1284_v61, %v1282_v13  ;;  %v1322_v61 = vld [vmem:[#allocation2 + $0xa8] sm:$0xff] }
 0x231   : > { %1627 = vmatprep.mubr.bf16.mxu1 %v1300_v42  ;;  %v1323_v42 = vld [vmem:[#allocation2 + $0xb0] sm:$0xff] }
 0x232   : > { %1628 = vmatmul.mubr.bf16.gmra.mrb[44].mxu1 %v1299_v24 }
 0x2ca   : > { %v1559_v44 = vpop.f32.mrb[32].mxu0 }
 0x2cb   : > { %v1638_v10 = vadd.f32 %v1559_v44, %v1301_v46  ;;  %v1561_v34 = vpop.f32.mrb[33].mxu0  ;;  %v1324_v44 = vld [vmem:[#allocation2 + $0xb8] sm:$0xff] }
 0x2cc   : > { %v1639_v29 = vadd.f32 %v1561_v34, %v1302_v4  ;;  %v1563_v7 = vpop.f32.mrb[34].mxu0 }
 0x2cd   : > { %1670 = vst [vmem:[#allocation2] sm:$0xff] %v1638_v10  ;;  %v1640_v28 = vadd.f32 %v1563_v7, %v1303_v5  ;;  %v1565_v39 = vpop.f32.mrb[35].mxu0  ;;  %v1325_v7 = vld [vmem:[#allocation2 + $0xc0] sm:$0xff] }
 0x2ce   : > { %1671 = vst [vmem:[#allocation2 + $0x8] sm:$0xff] %v1639_v29  ;;  %v1641_v11 = vadd.f32 %v1565_v39, %v1304_v35 }
 0x2cf   : > { %1672 = vst [vmem:[#allocation2 + $0x10] sm:$0xff] %v1640_v28  ;;  %v1326_v28 = vld [vmem:[#allocation2 + $0xc8] sm:$0xff] }
 0x2d0   : > { %1673 = vst [vmem:[#allocation2 + $0x18] sm:$0xff] %v1641_v11  ;;  %v1327_v11 = vld [vmem:[#allocation2 + $0xd0] sm:$0xff] }
 0x2d2   : > { %v1569_v9 = vpop.f32.mrb[36].mxu0 }
 0x2d3   : > { %v1642_v58 = vadd.f32 %v1569_v9, %v1305_v0  ;;  %v1571_v12 = vpop.f32.mrb[37].mxu0  ;;  %v1328_v9 = vld [vmem:[#allocation2 + $0xd8] sm:$0xff] }
 0x2d4   : > { %v1643_v2 = vadd.f32 %v1571_v12, %v1306_v48  ;;  %v1573_v15 = vpop.f32.mrb[38].mxu0 }
 0x2d5   : > { %1674 = vst [vmem:[#allocation2 + $0x20] sm:$0xff] %v1642_v58  ;;  %v1644_v60 = vadd.f32 %v1573_v15, %v1307_v55  ;;  %v1575_v20 = vpop.f32.mrb[39].mxu0  ;;  %v1329_v15 = vld [vmem:[#allocation2 + $0xe0] sm:$0xff] }
 0x2d6   : > { %1675 = vst [vmem:[#allocation2 + $0x28] sm:$0xff] %v1643_v2  ;;  %v1645_v6 = vadd.f32 %v1575_v20, %v1308_v3 }
 0x2d7   : > { %1676 = vst [vmem:[#allocation2 + $0x30] sm:$0xff] %v1644_v60  ;;  %v1330_v60 = vld [vmem:[#allocation2 + $0xe8] sm:$0xff] }
 0x2d8   : > { %1677 = vst [vmem:[#allocation2 + $0x38] sm:$0xff] %v1645_v6  ;;  %v1331_v6 = vld [vmem:[#allocation2 + $0xf0] sm:$0xff] }
 0x2db   : > { %v1579_v26 = vpop.f32.mrb[40].mxu0 }
 0x2dc   : > { %v1646_v30 = vadd.f32 %v1579_v26, %v1309_v25  ;;  %v1581_v18 = vpop.f32.mrb[41].mxu0  ;;  %v1332_v26 = vld [vmem:[#allocation2 + $0xf8] sm:$0xff] }
 0x2dd   : > { %v1647_v32 = vadd.f32 %v1581_v18, %v1310_v14  ;;  %v1583_v17 = vpop.f32.mrb[42].mxu0 }
 0x2de   : > { %1678 = vst [vmem:[#allocation2 + $0x40] sm:$0xff] %v1646_v30  ;;  %v1648_v19 = vadd.f32 %v1583_v17, %v1311_v52  ;;  %v1585_v63 = vpop.f32.mrb[43].mxu0  ;;  %v1706_v17 = vld [vmem:[#allocation2] sm:$0xff] (!%p2073_p4) }
 0x2df   : > { %1679 = vst [vmem:[#allocation2 + $0x48] sm:$0xff] %v1647_v32  ;;  %v1649_v36 = vadd.f32 %v1585_v63, %v1312_v49  ;;  %v1708_v63 = vld [vmem:[#allocation2 + $0x10] sm:$0xff] (!%p2073_p4)  ;;  %1738 = vst [vmem:[#allocation9] sm:$0xff] (!%p2073_p4), %v1706_v17 }
 0x2e0   : > { %1680 = vst [vmem:[#allocation2 + $0x50] sm:$0xff] %v1648_v19  ;;  %v1707_v19 = vld [vmem:[#allocation2 + $0x8] sm:$0xff] (!%p2073_p4)  ;;  %1740 = vst [vmem:[#allocation9 + $0x10] sm:$0xff] (!%p2073_p4), %v1708_v63 }
 0x2e1   : > { %1681 = vst [vmem:[#allocation2 + $0x58] sm:$0xff] %v1649_v36  ;;  %1739 = vst [vmem:[#allocation9 + $0x8] sm:$0xff] (!%p2073_p4), %v1707_v19  ;;  %v1709_v36 = vld [vmem:[#allocation2 + $0x18] sm:$0xff] (!%p2073_p4) }
 0x2e2   : > { %1741 = vst [vmem:[#allocation9 + $0x18] sm:$0xff] (!%p2073_p4), %v1709_v36 }
 0x2e3   : > { %v1589_v27 = vpop.f32.mrb[44].mxu0 }
 0x2e4   : > { %v1650_v21 = vadd.f32 %v1589_v27, %v1313_v37  ;;  %v1591_v59 = vpop.f32.mrb[45].mxu0  ;;  %v1710_v37 = vld [vmem:[#allocation2 + $0x20] sm:$0xff] (!%p2073_p4)  ;;  %v1712_v27 = vld [vmem:[#allocation2 + $0x30] sm:$0xff] (!%p2073_p4) }
 0x2e5   : > { %v1651_v41 = vadd.f32 %v1591_v59, %v1314_v53  ;;  %v1593_v43 = vpop.f32.mrb[46].mxu0  ;;  %v1711_v53 = vld [vmem:[#allocation2 + $0x28] sm:$0xff] (!%p2073_p4)  ;;  %1742 = vst [vmem:[#allocation9 + $0x20] sm:$0xff] (!%p2073_p4), %v1710_v37  ;;  %1744 = vst [vmem:[#allocation9 + $0x30] sm:$0xff] (!%p2073_p4), %v1712_v27 }
 0x2e6   : > { %1682 = vst [vmem:[#allocation2 + $0x60] sm:$0xff] %v1650_v21  ;;  %v1652_v45 = vadd.f32 %v1593_v43, %v1315_v31  ;;  %v1595_v47 = vpop.f32.mrb[47].mxu0  ;;  %1743 = vst [vmem:[#allocation9 + $0x28] sm:$0xff] (!%p2073_p4), %v1711_v53  ;;  %v1713_v31 = vld [vmem:[#allocation2 + $0x38] sm:$0xff] (!%p2073_p4)  ;;  %v1714_v21 = vld [vmem:[#allocation2 + $0x40] sm:$0xff] (!%p2073_p4) }
 0x2e7   : > { %1683 = vst [vmem:[#allocation2 + $0x68] sm:$0xff] %v1651_v41  ;;  %v1653_v1 = vadd.f32 %v1595_v47, %v1316_v23  ;;  %1745 = vst [vmem:[#allocation9 + $0x38] sm:$0xff] (!%p2073_p4), %v1713_v31  ;;  %v1715_v59 = vld [vmem:[#allocation2 + $0x48] sm:$0xff] (!%p2073_p4)  ;;  %v1716_v23 = vld [vmem:[#allocation2 + $0x50] sm:$0xff] (!%p2073_p4) }
 0x2e8   : > { %1684 = vst [vmem:[#allocation2 + $0x70] sm:$0xff] %v1652_v45  ;;  %1746 = vst [vmem:[#allocation9 + $0x40] sm:$0xff] (!%p2073_p4), %v1714_v21  ;;  %v1717_v41 = vld [vmem:[#allocation2 + $0x58] sm:$0xff] (!%p2073_p4) }
 0x2e9   : > { %1685 = vst [vmem:[#allocation2 + $0x78] sm:$0xff] %v1653_v1  ;;  %1747 = vst [vmem:[#allocation9 + $0x48] sm:$0xff] (!%p2073_p4), %v1715_v59 }
 0x2ea   : > { %1748 = vst [vmem:[#allocation9 + $0x50] sm:$0xff] (!%p2073_p4), %v1716_v23  ;;  %1749 = vst [vmem:[#allocation9 + $0x58] sm:$0xff] (!%p2073_p4), %v1717_v41 }
 0x2ec   : > { %v1599_v8 = vpop.f32.mrb[32].mxu1 }
 0x2ed   : > { %v1654_v40 = vadd.f32 %v1599_v8, %v1317_v33  ;;  %v1601_v16 = vpop.f32.mrb[33].mxu1  ;;  %v1718_v43 = vld [vmem:[#allocation2 + $0x60] sm:$0xff] (!%p2073_p4) }
 0x2ee   : > { %v1655_v62 = vadd.f32 %v1601_v16, %v1318_v57  ;;  %v1603_v51 = vpop.f32.mrb[34].mxu1  ;;  %v1719_v45 = vld [vmem:[#allocation2 + $0x68] sm:$0xff] (!%p2073_p4)  ;;  %1750 = vst [vmem:[#allocation9 + $0x60] sm:$0xff] (!%p2073_p4), %v1718_v43 }
 0x2ef   : > { %1686 = vst [vmem:[#allocation2 + $0x80] sm:$0xff] %v1654_v40  ;;  %v1656_v50 = vadd.f32 %v1603_v51, %v1319_v54  ;;  %v1605_v38 = vpop.f32.mrb[35].mxu1  ;;  %v1720_v47 = vld [vmem:[#allocation2 + $0x70] sm:$0xff] (!%p2073_p4)  ;;  %1751 = vst [vmem:[#allocation9 + $0x68] sm:$0xff] (!%p2073_p4), %v1719_v45 }
 0x2f0   : > { %1687 = vst [vmem:[#allocation2 + $0x88] sm:$0xff] %v1655_v62  ;;  %v1657_v13 = vadd.f32 %v1605_v38, %v1320_v56  ;;  %1752 = vst [vmem:[#allocation9 + $0x70] sm:$0xff] (!%p2073_p4), %v1720_v47  ;;  %v1721_v1 = vld [vmem:[#allocation2 + $0x78] sm:$0xff] (!%p2073_p4) }
 0x2f1   : > { %1688 = vst [vmem:[#allocation2 + $0x90] sm:$0xff] %v1656_v50  ;;  %1753 = vst [vmem:[#allocation9 + $0x78] sm:$0xff] (!%p2073_p4), %v1721_v1 }
 0x2f2   : > { %1689 = vst [vmem:[#allocation2 + $0x98] sm:$0xff] %v1657_v13 }
 0x2f4   : > { %v1609_v24 = vpop.f32.mrb[36].mxu1 }
 0x2f5   : > { %v1658_v46 = vadd.f32 %v1609_v24, %v1321_v22  ;;  %v1611_v4 = vpop.f32.mrb[37].mxu1 }
 0x2f6   : > { %v1659_v5 = vadd.f32 %v1611_v4, %v1322_v61  ;;  %v1613_v10 = vpop.f32.mrb[38].mxu1  ;;  %v1722_v33 = vld [vmem:[#allocation2 + $0x80] sm:$0xff] (!%p2073_p4) }
 0x2f7   : > { %1690 = vst [vmem:[#allocation2 + $0xa0] sm:$0xff] %v1658_v46  ;;  %v1660_v34 = vadd.f32 %v1613_v10, %v1323_v42  ;;  %v1615_v35 = vpop.f32.mrb[39].mxu1  ;;  %v1723_v57 = vld [vmem:[#allocation2 + $0x88] sm:$0xff] (!%p2073_p4)  ;;  %1754 = vst [vmem:[#allocation9 + $0x80] sm:$0xff] (!%p2073_p4), %v1722_v33 }
 0x2f8   : > { %1691 = vst [vmem:[#allocation2 + $0xa8] sm:$0xff] %v1659_v5  ;;  %v1661_v29 = vadd.f32 %v1615_v35, %v1324_v44  ;;  %1755 = vst [vmem:[#allocation9 + $0x88] sm:$0xff] (!%p2073_p4), %v1723_v57  ;;  %v1724_v8 = vld [vmem:[#allocation2 + $0x90] sm:$0xff] (!%p2073_p4) }
 0x2f9   : > { %1692 = vst [vmem:[#allocation2 + $0xb0] sm:$0xff] %v1660_v34  ;;  %v1725_v54 = vld [vmem:[#allocation2 + $0x98] sm:$0xff] (!%p2073_p4)  ;;  %1756 = vst [vmem:[#allocation9 + $0x90] sm:$0xff] (!%p2073_p4), %v1724_v8 }
 0x2fa   : > { %1693 = vst [vmem:[#allocation2 + $0xb8] sm:$0xff] %v1661_v29  ;;  %1757 = vst [vmem:[#allocation9 + $0x98] sm:$0xff] (!%p2073_p4), %v1725_v54 }
 0x2fd   : > { %v1619_v39 = vpop.f32.mrb[40].mxu1 }
 0x2fe   : > { %v1662_v0 = vadd.f32 %v1619_v39, %v1325_v7  ;;  %v1621_v48 = vpop.f32.mrb[41].mxu1  ;;  %v1726_v40 = vld [vmem:[#allocation2 + $0xa0] sm:$0xff] (!%p2073_p4) }
 0x2ff   : > { %v1663_v55 = vadd.f32 %v1621_v48, %v1326_v28  ;;  %v1623_v58 = vpop.f32.mrb[42].mxu1  ;;  %1758 = vst [vmem:[#allocation9 + $0xa0] sm:$0xff] (!%p2073_p4), %v1726_v40  ;;  %v1727_v16 = vld [vmem:[#allocation2 + $0xa8] sm:$0xff] (!%p2073_p4) }
 0x300   : > { %1694 = vst [vmem:[#allocation2 + $0xc0] sm:$0xff] %v1662_v0  ;;  %v1664_v12 = vadd.f32 %v1623_v58, %v1327_v11  ;;  %v1625_v3 = vpop.f32.mrb[43].mxu1  ;;  %v1728_v56 = vld [vmem:[#allocation2 + $0xb0] sm:$0xff] (!%p2073_p4)  ;;  %1759 = vst [vmem:[#allocation9 + $0xa8] sm:$0xff] (!%p2073_p4), %v1727_v16 }
 0x301   : > { %1695 = vst [vmem:[#allocation2 + $0xc8] sm:$0xff] %v1663_v55  ;;  %v1665_v2 = vadd.f32 %v1625_v3, %v1328_v9  ;;  %v1729_v62 = vld [vmem:[#allocation2 + $0xb8] sm:$0xff] (!%p2073_p4)  ;;  %1760 = vst [vmem:[#allocation9 + $0xb0] sm:$0xff] (!%p2073_p4), %v1728_v56 }
 0x302   : > { %1696 = vst [vmem:[#allocation2 + $0xd0] sm:$0xff] %v1664_v12  ;;  %1761 = vst [vmem:[#allocation9 + $0xb8] sm:$0xff] (!%p2073_p4), %v1729_v62 }
 0x303   : > { %1697 = vst [vmem:[#allocation2 + $0xd8] sm:$0xff] %v1665_v2 }
 0x305   : > { %v1629_v20 = vpop.f32.mrb[44].mxu1  ;;  %1705 = sbr.rel (%p2073_p4) target bundleno = 788 (0x314), region = 52 }
 0x306   : > { %v1666_v25 = vadd.f32 %v1629_v20, %v1329_v15  ;;  %v1631_v14 = vpop.f32.mrb[45].mxu1 }
 0x307   : > { %v1667_v52 = vadd.f32 %v1631_v14, %v1330_v60  ;;  %v1633_v30 = vpop.f32.mrb[46].mxu1  ;;  %v1730_v51 = vld [vmem:[#allocation2 + $0xc0] sm:$0xff] (!%p2073_p4) }
 0x308   : > { %1698 = vst [vmem:[#allocation2 + $0xe0] sm:$0xff] %v1666_v25  ;;  %v1668_v18 = vadd.f32 %v1633_v30, %v1331_v6  ;;  %v1635_v49 = vpop.f32.mrb[47].mxu1  ;;  %v1731_v50 = vld [vmem:[#allocation2 + $0xc8] sm:$0xff] (!%p2073_p4)  ;;  %1762 = vst [vmem:[#allocation9 + $0xc0] sm:$0xff] (!%p2073_p4), %v1730_v51 }
 0x309   : > { %1699 = vst [vmem:[#allocation2 + $0xe8] sm:$0xff] %v1667_v52  ;;  %v1669_v32 = vadd.f32 %v1635_v49, %v1332_v26  ;;  %v1732_v38 = vld [vmem:[#allocation2 + $0xd0] sm:$0xff] (!%p2073_p4)  ;;  %1763 = vst [vmem:[#allocation9 + $0xc8] sm:$0xff] (!%p2073_p4), %v1731_v50 }
 0x30a   : > { %1700 = vst [vmem:[#allocation2 + $0xf0] sm:$0xff] %v1668_v18  ;;  %1764 = vst [vmem:[#allocation9 + $0xd0] sm:$0xff] (!%p2073_p4), %v1732_v38  ;;  %v1733_v13 = vld [vmem:[#allocation2 + $0xd8] sm:$0xff] (!%p2073_p4) }
 0x30b   : > { %1701 = vst [vmem:[#allocation2 + $0xf8] sm:$0xff] %v1669_v32  ;;  %1765 = vst [vmem:[#allocation9 + $0xd8] sm:$0xff] (!%p2073_p4), %v1733_v13 }
 0x30f   : > { %v1734_v22 = vld [vmem:[#allocation2 + $0xe0] sm:$0xff] }
 0x310   : > { %v1735_v61 = vld [vmem:[#allocation2 + $0xe8] sm:$0xff]  ;;  %1766 = vst [vmem:[#allocation9 + $0xe0] sm:$0xff] %v1734_v22 }
 0x311   : > { %1767 = vst [vmem:[#allocation9 + $0xe8] sm:$0xff] %v1735_v61  ;;  %v1736_v24 = vld [vmem:[#allocation2 + $0xf0] sm:$0xff] }
 0x312   : > { %v1737_v42 = vld [vmem:[#allocation2 + $0xf8] sm:$0xff]  ;;  %1768 = vst [vmem:[#allocation9 + $0xf0] sm:$0xff] %v1736_v24 }
 0x313   : > { %1769 = vst [vmem:[#allocation9 + $0xf8] sm:$0xff] %v1737_v42 }
 0x314 PF: > { %p2139_p6 = scmp.eq.s32.totalorder %s2707_s18, 1  ;;  %s2655_s15 = smov [#allocation9]  }
 0x315   : > { %s1780_s23 = sshll.u32 %s2655_s15, 4  ;;  %s1781_s23 = int_to_ptr.vmem [resolvable:$true] %s1780_s23 }
 0x316   : > { %s2556_s4 = scalar_lea.vmem %s1781_s23, 4096  ;;  %p2563_p13 = scmp.lt.s32.totalorder %s1781_s23, %s1781_s23 }
 0x317   : > { %p2557_p7 = scmp.ne.s32.totalorder %s1781_s23, %s2556_s4  ;;  %p2564_p5 = scmp.lt.s32.totalorder %s2556_s4, %s2556_s4 }
 0x319   : > { %p2558_p9 = pnand %p2557_p7, %p2139_p6  ;;  %p2565_p8 = por %p2564_p5, %p2563_p13 }
 0x31b   : > { %p2559_p11 = pneg %p2558_p9 }
 0x31d   : > { %p2566_p12 = pnand %p2565_p8, %p2559_p11 }
 0x31f   : > { %2569 = shalt.err (!%p2566_p12)
}
 0x320   : > { %s2570_s20 = scalar_lea.hbm %s3200_s3, 4096 }
 0x321   : > { %p2571_p10 = scmp.ne.s32.totalorder %s3200_s3, %s2570_s20  ;;  %p2576_p3 = scmp.lt.u32.totalorder %s2570_s20, %s3200_s3 }
 0x323   : > { %p2572_p0 = pnand %p2571_p10, %p2139_p6 }
 0x325   : > { %p2573_p1 = pneg %p2572_p0 }
 0x327   : > { %p2578_p2 = pnand %p2576_p3, %p2573_p1 }
 0x329   : > { %2581 = shalt.err (!%p2578_p2)
}
 0x32a   : > { %s2656_s6 = smov 256   ;;  %s2657_s9 = smov 16  }
 0x32b   : > { %2130 = dma.vmem_to_hbm [thread:$0]  (%p2139_p6), %s1781_s23, 4096, %s3200_s3, [#allocation5], %s2656_s6, %s2656_s6, %s2657_s9  }
 0x32c   : > { %2615 = dma.done.wait (%p2139_p6), [#allocation5], 4096  }
 0x32d   : > { %2617 = vsyncadd (%p2139_p6), [#allocation5], 4294963200 }
 0x32e PF: > { %s18_s17 = sadd.s32 1, %s2640_s17   ;;  %s3214_s12 = smov %s2624_s13 }
 0x32f   : > { %p15_p4 = scmp.ge.s32.totalorder %s18_s17, 4   ;;  %s3215_s13 = smov %s2628_s14 }
 0x330   : > { %s3216_s14 = smov %s2733_s24  ;;  %s3217_s15 = smov %s2636_s16 }
 0x331   : > { %s3218_s16 = smov %s3220_s19  ;;  %17 = sbr.rel (!%p15_p4) target bundleno = 6 (0x6), region = 101 }
 0x338   :  { %1796 = vsyncpa [#allocation4], 1 }
 0x339   :  { %1798 = vsyncpa [#allocation4 + $0x1], 1 }
 0x33a   :  { %1799 = vsyncpa [#allocation7], 1 }
 0x33b   :  { %1801 = vsyncpa [#allocation7 + $0x1], 1 }
 0x33c   :  { %1802 = vsyncpa [#allocation5], 1 }
 0x33d   :  { %1804 = vsyncpa [#allocation5 + $0x1], 1 }

</bundles_post_ra>
